<compile_context>
chip_gen: v6e
topology: v6e:2x2x1
jax: 0.10.0
libtpu: 0.0.40
codegen_flags: <defaults>
</compile_context>

<pallas_src>
import functools
import math

import jax
import jax.numpy as jnp
from jax.experimental import pallas as pl
from jax.experimental.pallas import tpu as pltpu

LANE = 128


def _round_up(n, m):
    return (n + m - 1) // m * m


def _gelu_tanh(x):
    # tanh-form GELU (tanh runs on the otherwise-idle EUP slot).
    # TODO(synk): PyTorch F.gelu defaults to the erf form; tanh-form differs by
    #             <~3e-3 per activation.
    c = 0.7978845608028654  # sqrt(2/pi)
    return 0.5 * x * (1.0 + jnp.tanh(c * (x + 0.044715 * x * x * x)))


def _single_buffer_kwargs():
    """BlockSpec kwargs that single-buffer a constant (never re-indexed) input.

    Falls back to default (double-buffered) pipelining if this JAX build does not
    expose BlockSpec.pipeline_mode / pl.Buffered.
    """
    try:
        kw = {"pipeline_mode": pl.Buffered(1)}
        pl.BlockSpec((8, LANE), lambda i: (0, 0), **kw)  # probe construction only
        return kw
    except Exception:
        return {}


_ONCE = _single_buffer_kwargs()


def _feature_extractor_kernel(
    x_ref, f0_ref, tapmask_ref, chmask_ref,
    in_w, in_b, f0c1_w, f0c1_b, f0c2_w, f0c2_b,
    dw_w, dw_b, ss_w, ss_b, pw1_w, pw1_b, pw2_w, pw2_b, blk_s,
    o_ref, c_ref,
    *, kernel_size, real_c, eps,
):
    f32, bf16 = jnp.float32, jnp.bfloat16
    layer = pl.program_id(1)
    BT = o_ref.shape[1]
    C_pad = o_ref.shape[2]
    pad = kernel_size // 2

    # ---- once per batch block (layer 0): input 1x1 conv + F0Encoder.
    #      Batch is folded into M, so each matmul sees M = B_blk*T rows.
    @pl.when(layer == 0)
    def _():
        x = x_ref[0]                                          # (BT, Cin_pad) f32
        h0 = jnp.dot(x.astype(bf16), in_w[...],
                     preferred_element_type=f32) + in_b[...]
        o_ref[0] = h0                                         # residual-stream carrier
        f0 = f0_ref[0]                                        # (BT, 1)
        c0 = jnp.sin(f0 * f0c1_w[...] + f0c1_b[...])          # Conv1d(1->C,1) + sin
        c_ref[...] = jnp.dot(c0.astype(bf16), f0c2_w[...],
                             preferred_element_type=f32) + f0c2_b[...]

    h = o_ref[0]                                              # (BT, C_pad) f32
    c = c_ref[...]

    # ---- depthwise Conv1d(C, C, K, padding=K//2, groups=C), fully in registers:
    #      each tap is a static sublane shift (slice+concat) of h; tapmask zeroes
    #      rows whose shifted source falls outside the SAME batch element (this
    #      also covers the global ends), so no halo scratch / VMEM round trip.
    y = h * dw_w[0, pad] + dw_b[0]                            # center tap
    if pad > 0:
        zrows = jnp.zeros((pad, C_pad), f32)
        for k in range(kernel_size):
            d = k - pad
            if d == 0:
                continue
            if d > 0:
                tap = jnp.concatenate([h[d:, :], zrows[:d, :]], axis=0)
            else:
                tap = jnp.concatenate([zrows[:-d, :], h[:BT + d, :]], axis=0)
            y = y + tap * tapmask_ref[k] * dw_w[0, k]

    # ---- adaptive channel norm over the REAL C channels (padded lanes of y are 0).
    #      Two-pass variance; chmask zeroes the padded lanes of (y - mu) so the
    #      moment sums (and everything downstream) stay exact.
    mu = jnp.sum(y, axis=-1, keepdims=True) * (1.0 / real_c)
    dm = (y - mu) * chmask_ref[...]
    var = jnp.sum(dm * dm, axis=-1, keepdims=True) * (1.0 / (real_c - 1.0))
    sigma = jnp.sqrt(var) + eps

    # per-layer fused shift||scale projection of the conditioning c.
    ss = jnp.dot(c.astype(bf16), ss_w[0], preferred_element_type=f32) + ss_b[0]
    shift = ss[:, :C_pad]
    scale = ss[:, C_pad:]
    yn = (dm / sigma) * scale + shift                         # exact divide (cheap)

    # ---- pointwise MLP (MXU, bf16 in / f32 acc), learned scale, residual.
    m = jnp.dot(yn.astype(bf16), pw1_w[0], preferred_element_type=f32) + pw1_b[0]
    m = _gelu_tanh(m)
    yo = jnp.dot(m.astype(bf16), pw2_w[0], preferred_element_type=f32) + pw2_b[0]
    o_ref[0] = h + yo * blk_s[0]


def feature_extractor_pallas(x, f0, params, *, num_layers, kernel_size, eps,
                             batch_block=None, trim_output=True):
    B, T, Cin = x.shape
    C = params["in_w"].shape[1]
    H = params["pw1_w"].shape[2]
    L, K = num_layers, kernel_size
    pad = K // 2

    if batch_block is None:
        batch_block = B     # one slab per layer step; shrink for very large B*T
    assert B % batch_block == 0
    n_blk = B // batch_block
    BT = batch_block * T

    Cin_p = _round_up(Cin, LANE)
    C_p = _round_up(C, LANE)
    H_p = _round_up(H, LANE)

    f32, bf16 = jnp.float32, jnp.bfloat16

    def padw(a, shape):
        return jnp.pad(a, [(0, s - d) for d, s in zip(a.shape, shape)])

    # lane-padded (zero-filled) weights; MXU-weight operands cast to bf16.
    in_w = padw(params["in_w"], (Cin_p, C_p)).astype(bf16)
    in_b = padw(params["in_b"], (1, C_p))
    f0c1_w = padw(params["f0c1_w"], (1, C_p))
    f0c1_b = padw(params["f0c1_b"], (1, C_p))
    f0c2_w = padw(params["f0c2_w"], (C_p, C_p)).astype(bf16)
    f0c2_b = padw(params["f0c2_b"], (1, C_p))
    dw_w = padw(params["dw_w"], (L, K, 1, C_p))     # f32: VPU path (v5e has no bf16 VALU)
    dw_b = padw(params["dw_b"], (L, 1, C_p))
    pw1_w = padw(params["pw1_w"], (L, C_p, H_p)).astype(bf16)
    pw1_b = padw(params["pw1_b"], (L, 1, H_p))
    pw2_w = padw(params["pw2_w"], (L, H_p, C_p)).astype(bf16)
    pw2_b = padw(params["pw2_b"], (L, 1, C_p))
    blk_s = padw(params["blk_s"], (L, 1, C_p))

    # Per-layer fused shift||scale projection: ss_w[l] = [ sh_w[l] | sc_w[l] ].
    ss_w = jnp.zeros((L, C_p, 2 * C_p), f32)
    ss_w = ss_w.at[:, :C, :C].set(params["sh_w"])
    ss_w = ss_w.at[:, :C, C_p:C_p + C].set(params["sc_w"])
    ss_w = ss_w.astype(bf16)
    ss_b = jnp.zeros((L, 1, 2 * C_p), f32)
    ss_b = ss_b.at[:, :, :C].set(params["sh_b"])
    ss_b = ss_b.at[:, :, C_p:C_p + C].set(params["sc_b"])

    # Fold batch into the matmul M dimension: (n_blk, B_blk*T, ...) slabs.
    x_p = padw(x, (B, T, Cin_p)).reshape(n_blk, BT, Cin_p)
    f0_r = f0.reshape(n_blk, BT, 1)

    # Per-row boundary mask for each depthwise tap offset (zeroes rows whose
    # shifted source index leaves the batch element), and the real-channel mask.
    t_in = jnp.arange(BT, dtype=jnp.int32) % T
    tapmask = jnp.stack(
        [((t_in + (k - pad) >= 0) & (t_in + (k - pad) < T)).astype(f32)
         for k in range(K)], axis=0)[:, :, None]              # (K, BT, 1)
    chmask = (jnp.arange(C_p) < C).astype(f32)[None, :]        # (1, C_p)

    const_ws = [in_w, in_b, f0c1_w, f0c1_b, f0c2_w, f0c2_b]
    layer_ws = [dw_w, dw_b, ss_w, ss_b, pw1_w, pw1_b, pw2_w, pw2_b, blk_s]

    def const_spec(a):                       # constant across the grid: 1 buffer
        nd = a.ndim
        return pl.BlockSpec(a.shape, lambda b, l, _z=(0,) * nd: _z, **_ONCE)

    def layer_spec(a):                       # blocked on the layer axis: 2 buffers
        nd = a.ndim                          # (next layer's weights prefetch during
        return pl.BlockSpec((1,) + a.shape[1:],            # current layer compute)
                            lambda b, l, _z=(0,) * (nd - 1): (l,) + _z)

    in_specs = (
        [pl.BlockSpec((1, BT, Cin_p), lambda b, l: (b, 0, 0)),   # x slab
         pl.BlockSpec((1, BT, 1), lambda b, l: (b, 0, 0)),       # f0 slab
         const_spec(tapmask), const_spec(chmask)]
        + [const_spec(w) for w in const_ws]
        + [layer_spec(w) for w in layer_ws]
    )

    kernel = functools.partial(
        _feature_extractor_kernel,
        kernel_size=K, real_c=float(C), eps=eps,
    )

    out = pl.pallas_call(
        kernel,
        out_shape=jax.ShapeDtypeStruct((n_blk, BT, C_p), jnp.float32),
        grid=(n_blk, L),
        in_specs=in_specs,
        out_specs=pl.BlockSpec((1, BT, C_p), lambda b, l: (b, 0, 0)),
        scratch_shapes=[pltpu.VMEM((BT, C_p), jnp.float32)],   # F0 conditioning c
        compiler_params=pltpu.CompilerParams(
            dimension_semantics=("parallel", "arbitrary"),
            # safe on every generation (v7x physical VMEM is 64 MiB); size
            # batch_block so the per-step slabs stay well under this.
            vmem_limit_bytes=48 * 1024 * 1024,
        ),
    )(x_p, f0_r, tapmask, chmask, *const_ws, *layer_ws)

    out = out.reshape(B, T, C_p)
    if trim_output:
        # TODO(synk): production consumers should take the lane-padded (B,T,C_p)
        #             output directly; this slice is an extra HBM round trip.
        return out[..., :C]
    return out


def reference_forward(x, f0, p, *, num_layers, kernel_size, eps):
    """Pure-JAX f32 reference (channels-last), mirrors PyTorch forward semantics."""
    h = x @ p["in_w"] + p["in_b"]
    c = jnp.sin(f0 * p["f0c1_w"] + p["f0c1_b"])
    c = c @ p["f0c2_w"] + p["f0c2_b"]
    pad = kernel_size // 2
    T, Cn = h.shape[1], h.shape[2]
    for l in range(num_layers):
        res = h
        hp = jnp.pad(h, ((0, 0), (pad, pad), (0, 0)))
        y = p["dw_b"][l]
        for k in range(kernel_size):
            y = y + hp[:, k:k + T, :] * p["dw_w"][l, k]
        mu = jnp.mean(y, axis=-1, keepdims=True)
        d = y - mu
        sigma = jnp.sqrt(jnp.sum(d * d, axis=-1, keepdims=True) / (Cn - 1)) + eps
        shift = c @ p["sh_w"][l] + p["sh_b"][l]
        scale = c @ p["sc_w"][l] + p["sc_b"][l]
        yn = (d / sigma) * scale + shift
        m = jax.nn.gelu(yn @ p["pw1_w"][l] + p["pw1_b"][l], approximate=False)
        yo = m @ p["pw2_w"][l] + p["pw2_b"][l]
        h = res + yo * p["blk_s"][l]
    return h


if __name__ == "__main__":
    # Small shapes consistent with the module (input_channels, channels, hidden, layers, kernel).
    B, T = 2, 16
    Cin, C, H = 32, 16, 32
    L, K = 2, 7
    EPS = 1e-6

    key = jax.random.PRNGKey(0)
    ks = jax.random.split(key, 20)

    def nrm(k, shape, std):
        return (jax.random.normal(k, shape) * std).astype(jnp.float32)

    params = {
        # input_layer: Conv1d(Cin, C, 1)
        "in_w":  nrm(ks[0], (Cin, C), 1.0 / math.sqrt(Cin)),
        "in_b":  nrm(ks[1], (1, C), 0.02),
        # F0Encoder.c1: Conv1d(1, C, 1), weight ~ N(0, 0.3) per module init
        "f0c1_w": nrm(ks[2], (1, C), 0.3),
        "f0c1_b": nrm(ks[3], (1, C), 0.02),
        # F0Encoder.c2: Conv1d(C, C, 1)
        "f0c2_w": nrm(ks[4], (C, C), 1.0 / math.sqrt(C)),
        "f0c2_b": nrm(ks[5], (1, C), 0.02),
        # per-layer AdaptiveConvNeXt1d parameters (stacked on a leading layer dim)
        "dw_w":  nrm(ks[6], (L, K, 1, C), 1.0 / math.sqrt(K)),   # depthwise Conv1d(C,C,K,groups=C)
        "dw_b":  nrm(ks[7], (L, 1, C), 0.02),
        "sh_w":  nrm(ks[8], (L, C, C), 1.0 / math.sqrt(C)),      # norm.to_shift (1x1 conv)
        "sh_b":  nrm(ks[9], (L, 1, C), 0.02),
        "sc_w":  nrm(ks[10], (L, C, C), 1.0 / math.sqrt(C)),     # norm.to_scale
        "sc_b":  nrm(ks[11], (L, 1, C), 0.02),
        "pw1_w": nrm(ks[12], (L, C, H), 1.0 / math.sqrt(C)),     # pw_conv1 (C -> H)
        "pw1_b": nrm(ks[13], (L, 1, H), 0.02),
        "pw2_w": nrm(ks[14], (L, H, C), 1.0 / math.sqrt(H)),     # pw_conv2 (H -> C)
        "pw2_b": nrm(ks[15], (L, 1, C), 0.02),
        # self.scale = Parameter(ones(1, C, 1) * (1/num_layers))
        "blk_s": jnp.full((L, 1, C), 1.0 / L, dtype=jnp.float32),
    }

    x = jax.random.normal(ks[16], (B, T, Cin), dtype=jnp.float32)   # == PyTorch (B, Cin, T).T
    f0 = jax.random.normal(ks[17], (B, T, 1), dtype=jnp.float32)    # == PyTorch (B, 1, T).T

    out = feature_extractor_pallas(x, f0, params, num_layers=L, kernel_size=K, eps=EPS)
    out = jax.block_until_ready(out)

    ref = reference_forward(x, f0, params, num_layers=L, kernel_size=K, eps=EPS)

    assert out.shape == (B, T, C)
    assert bool(jnp.all(jnp.isfinite(out)))
    # Tolerance covers bf16 MXU operands and the tanh-form GELU (reference is
    # exact f32 / erf-GELU); the channel-norm divide is now exact.
    err = float(jnp.max(jnp.abs(out - ref)))
    assert err < 1e-1, f"Pallas kernel mismatch vs JAX reference (max abs err {err})"
    print("KERNEL_OK")
</pallas_src>

<mosaic_0001>
module attributes {stable_mosaic.version = 11 : i64} {
  func.func @_feature_extractor_kernel(%arg0: i32, %arg1: i32, %arg2: memref<1x32x128xf32, #tpu.memory_space<vmem>>, %arg3: memref<1x32x1xf32, #tpu.memory_space<vmem>>, %arg4: memref<7x32x1xf32, #tpu.memory_space<vmem>>, %arg5: memref<1x128xf32, #tpu.memory_space<vmem>>, %arg6: memref<128x128xbf16, #tpu.memory_space<vmem>>, %arg7: memref<1x128xf32, #tpu.memory_space<vmem>>, %arg8: memref<1x128xf32, #tpu.memory_space<vmem>>, %arg9: memref<1x128xf32, #tpu.memory_space<vmem>>, %arg10: memref<128x128xbf16, #tpu.memory_space<vmem>>, %arg11: memref<1x128xf32, #tpu.memory_space<vmem>>, %arg12: memref<1x7x1x128xf32, #tpu.memory_space<vmem>>, %arg13: memref<1x1x128xf32, #tpu.memory_space<vmem>>, %arg14: memref<1x128x256xbf16, #tpu.memory_space<vmem>>, %arg15: memref<1x1x256xf32, #tpu.memory_space<vmem>>, %arg16: memref<1x128x128xbf16, #tpu.memory_space<vmem>>, %arg17: memref<1x1x128xf32, #tpu.memory_space<vmem>>, %arg18: memref<1x128x128xbf16, #tpu.memory_space<vmem>>, %arg19: memref<1x1x128xf32, #tpu.memory_space<vmem>>, %arg20: memref<1x1x128xf32, #tpu.memory_space<vmem>>, %arg21: memref<1x32x128xf32, #tpu.memory_space<vmem>>, %arg22: memref<32x128xf32, #tpu.memory_space<vmem>>) attributes {dimension_semantics = [#tpu.dimension_semantics<parallel>, #tpu.dimension_semantics<arbitrary>], iteration_bounds = array<i64: 1, 2>, scalar_prefetch = 0 : i64, scratch_operands = 1 : i64, tpu.core_type = #tpu.core_type<tc>, window_params = [{transform_indices = @transform_0, window_bounds = array<i64: 1, 32, 128>}, {transform_indices = @transform_1, window_bounds = array<i64: 1, 32, 1>}, {pipeline_mode = #tpu.pipeline_mode<synchronous>, transform_indices = @transform_2, window_bounds = array<i64: 7, 32, 1>}, {pipeline_mode = #tpu.pipeline_mode<synchronous>, transform_indices = @transform_3, window_bounds = array<i64: 1, 128>}, {pipeline_mode = #tpu.pipeline_mode<synchronous>, transform_indices = @transform_4, window_bounds = array<i64: 128, 128>}, {pipeline_mode = #tpu.pipeline_mode<synchronous>, transform_indices = @transform_5, window_bounds = array<i64: 1, 128>}, {pipeline_mode = #tpu.pipeline_mode<synchronous>, transform_indices = @transform_6, window_bounds = array<i64: 1, 128>}, {pipeline_mode = #tpu.pipeline_mode<synchronous>, transform_indices = @transform_7, window_bounds = array<i64: 1, 128>}, {pipeline_mode = #tpu.pipeline_mode<synchronous>, transform_indices = @transform_8, window_bounds = array<i64: 128, 128>}, {pipeline_mode = #tpu.pipeline_mode<synchronous>, transform_indices = @transform_9, window_bounds = array<i64: 1, 128>}, {transform_indices = @transform_10, window_bounds = array<i64: 1, 7, 1, 128>}, {transform_indices = @transform_11, window_bounds = array<i64: 1, 1, 128>}, {transform_indices = @transform_12, window_bounds = array<i64: 1, 128, 256>}, {transform_indices = @transform_13, window_bounds = array<i64: 1, 1, 256>}, {transform_indices = @transform_14, window_bounds = array<i64: 1, 128, 128>}, {transform_indices = @transform_15, window_bounds = array<i64: 1, 1, 128>}, {transform_indices = @transform_16, window_bounds = array<i64: 1, 128, 128>}, {transform_indices = @transform_17, window_bounds = array<i64: 1, 1, 128>}, {transform_indices = @transform_18, window_bounds = array<i64: 1, 1, 128>}, {transform_indices = @transform_19, window_bounds = array<i64: 1, 32, 128>}]} {
    %c0_i32 = arith.constant 0 : i32
    %0 = arith.cmpi eq, %arg1, %c0_i32 : i32
    %1 = arith.extui %0 : i1 to i32
    %c0_i32_0 = arith.constant 0 : i32
    %2 = arith.cmpi ne, %1, %c0_i32_0 : i32
    scf.if %2 {
      %c0_86 = arith.constant 0 : index
      %c0_87 = arith.constant 0 : index
      %c0_88 = arith.constant 0 : index
      %153 = vector.load %arg2[%c0_86, %c0_87, %c0_88] : memref<1x32x128xf32, #tpu.memory_space<vmem>>, vector<1x32x128xf32>
      %154 = vector.shape_cast %153 : vector<1x32x128xf32> to vector<32x128xf32>
      %155 = arith.truncf %154 : vector<32x128xf32> to vector<32x128xbf16>
      %c0_89 = arith.constant 0 : index
      %c0_90 = arith.constant 0 : index
      %156 = vector.load %arg6[%c0_89, %c0_90] : memref<128x128xbf16, #tpu.memory_space<vmem>>, vector<128x128xbf16>
      %cst_91 = arith.constant dense<0.000000e+00> : vector<32x128xf32>
      %157 = tpu.matmul %155, %156, %cst_91 {dimension_numbers = #tpu.dot_dimension_numbers<[1], [0], [0], [1], [0, 0, 1, 1], [], []>} : vector<32x128xbf16>, vector<128x128xbf16>, vector<32x128xf32> -> vector<32x128xf32>
      %c0_92 = arith.constant 0 : index
      %c0_93 = arith.constant 0 : index
      %158 = vector.load %arg7[%c0_92, %c0_93] : memref<1x128xf32, #tpu.memory_space<vmem>>, vector<1x128xf32>
      %159 = vector.broadcast %158 : vector<1x128xf32> to vector<32x128xf32>
      %160 = arith.addf %157, %159 : vector<32x128xf32>
      %c0_94 = arith.constant 0 : index
      %c0_95 = arith.constant 0 : index
      %c0_96 = arith.constant 0 : index
      %161 = vector.load %arg21[%c0_94, %c0_95, %c0_96] : memref<1x32x128xf32, #tpu.memory_space<vmem>>, vector<1x32x128xf32>
      %162 = vector.shape_cast %161 : vector<1x32x128xf32> to vector<32x128xf32>
      %163 = vector.shape_cast %160 : vector<32x128xf32> to vector<1x32x128xf32>
      tpu.vector_store %arg21[%c0_94, %c0_95, %c0_96], %163 {strides = array<i32>} : memref<1x32x128xf32, #tpu.memory_space<vmem>>, vector<1x32x128xf32>,
      %c0_97 = arith.constant 0 : index
      %c0_98 = arith.constant 0 : index
      %c0_99 = arith.constant 0 : index
      %164 = vector.load %arg3[%c0_97, %c0_98, %c0_99] : memref<1x32x1xf32, #tpu.memory_space<vmem>>, vector<1x32x1xf32>
      %165 = vector.shape_cast %164 : vector<1x32x1xf32> to vector<32x1xf32>
      %c0_100 = arith.constant 0 : index
      %c0_101 = arith.constant 0 : index
      %166 = vector.load %arg8[%c0_100, %c0_101] : memref<1x128xf32, #tpu.memory_space<vmem>>, vector<1x128xf32>
      %167 = vector.broadcast %165 : vector<32x1xf32> to vector<32x128xf32>
      %168 = vector.broadcast %166 : vector<1x128xf32> to vector<32x128xf32>
      %169 = arith.mulf %167, %168 : vector<32x128xf32>
      %c0_102 = arith.constant 0 : index
      %c0_103 = arith.constant 0 : index
      %170 = vector.load %arg9[%c0_102, %c0_103] : memref<1x128xf32, #tpu.memory_space<vmem>>, vector<1x128xf32>
      %171 = vector.broadcast %170 : vector<1x128xf32> to vector<32x128xf32>
      %172 = arith.addf %169, %171 : vector<32x128xf32>
      %173 = math.sin %172 : vector<32x128xf32>
      %174 = arith.truncf %173 : vector<32x128xf32> to vector<32x128xbf16>
      %c0_104 = arith.constant 0 : index
      %c0_105 = arith.constant 0 : index
      %175 = vector.load %arg10[%c0_104, %c0_105] : memref<128x128xbf16, #tpu.memory_space<vmem>>, vector<128x128xbf16>
      %cst_106 = arith.constant dense<0.000000e+00> : vector<32x128xf32>
      %176 = tpu.matmul %174, %175, %cst_106 {dimension_numbers = #tpu.dot_dimension_numbers<[1], [0], [0], [1], [0, 0, 1, 1], [], []>} : vector<32x128xbf16>, vector<128x128xbf16>, vector<32x128xf32> -> vector<32x128xf32>
      %c0_107 = arith.constant 0 : index
      %c0_108 = arith.constant 0 : index
      %177 = vector.load %arg11[%c0_107, %c0_108] : memref<1x128xf32, #tpu.memory_space<vmem>>, vector<1x128xf32>
      %178 = vector.broadcast %177 : vector<1x128xf32> to vector<32x128xf32>
      %179 = arith.addf %176, %178 : vector<32x128xf32>
      %c0_109 = arith.constant 0 : index
      %c0_110 = arith.constant 0 : index
      %180 = vector.load %arg22[%c0_109, %c0_110] : memref<32x128xf32, #tpu.memory_space<vmem>>, vector<32x128xf32>
      tpu.vector_store %arg22[%c0_109, %c0_110], %179 {strides = array<i32>} : memref<32x128xf32, #tpu.memory_space<vmem>>, vector<32x128xf32>,
    } else {
    }
    %c0 = arith.constant 0 : index
    %c0_1 = arith.constant 0 : index
    %c0_2 = arith.constant 0 : index
    %3 = vector.load %arg21[%c0, %c0_1, %c0_2] : memref<1x32x128xf32, #tpu.memory_space<vmem>>, vector<1x32x128xf32>
    %4 = vector.shape_cast %3 : vector<1x32x128xf32> to vector<32x128xf32>
    %c0_3 = arith.constant 0 : index
    %c0_4 = arith.constant 0 : index
    %5 = vector.load %arg22[%c0_3, %c0_4] : memref<32x128xf32, #tpu.memory_space<vmem>>, vector<32x128xf32>
    %c0_5 = arith.constant 0 : index
    %c3 = arith.constant 3 : index
    %c0_6 = arith.constant 0 : index
    %c0_7 = arith.constant 0 : index
    %6 = vector.load %arg12[%c0_5, %c3, %c0_6, %c0_7] : memref<1x7x1x128xf32, #tpu.memory_space<vmem>>, vector<1x1x1x128xf32>
    %7 = vector.shape_cast %6 : vector<1x1x1x128xf32> to vector<1x128xf32>
    %8 = vector.broadcast %7 : vector<1x128xf32> to vector<32x128xf32>
    %9 = arith.mulf %4, %8 : vector<32x128xf32>
    %c0_8 = arith.constant 0 : index
    %c0_9 = arith.constant 0 : index
    %c0_10 = arith.constant 0 : index
    %10 = vector.load %arg13[%c0_8, %c0_9, %c0_10] : memref<1x1x128xf32, #tpu.memory_space<vmem>>, vector<1x1x128xf32>
    %11 = vector.shape_cast %10 : vector<1x1x128xf32> to vector<1x128xf32>
    %12 = vector.broadcast %11 : vector<1x128xf32> to vector<32x128xf32>
    %13 = arith.addf %9, %12 : vector<32x128xf32>
    %cst = arith.constant 0.000000e+00 : f32
    %14 = vector.broadcast %cst : f32 to vector<3x128xf32>
    %15 = vector.extract_strided_slice %4 {offsets = [0, 0], sizes = [29, 128], strides = [1, 1]} : vector<32x128xf32> to vector<29x128xf32>
    %16 = tpu.concatenate %14, %15 in 0 : vector<3x128xf32>, vector<29x128xf32> -> vector<32x128xf32>
    %c0_11 = arith.constant 0 : index
    %c0_12 = arith.constant 0 : index
    %c0_13 = arith.constant 0 : index
    %17 = vector.load %arg4[%c0_11, %c0_12, %c0_13] : memref<7x32x1xf32, #tpu.memory_space<vmem>>, vector<1x32x1xf32>
    %18 = vector.shape_cast %17 : vector<1x32x1xf32> to vector<32x1xf32>
    %19 = vector.broadcast %18 : vector<32x1xf32> to vector<32x128xf32>
    %20 = arith.mulf %16, %19 : vector<32x128xf32>
    %c0_14 = arith.constant 0 : index
    %c0_15 = arith.constant 0 : index
    %c0_16 = arith.constant 0 : index
    %c0_17 = arith.constant 0 : index
    %21 = vector.load %arg12[%c0_14, %c0_15, %c0_16, %c0_17] : memref<1x7x1x128xf32, #tpu.memory_space<vmem>>, vector<1x1x1x128xf32>
    %22 = vector.shape_cast %21 : vector<1x1x1x128xf32> to vector<1x128xf32>
    %23 = vector.broadcast %22 : vector<1x128xf32> to vector<32x128xf32>
    %24 = arith.mulf %20, %23 : vector<32x128xf32>
    %25 = arith.addf %13, %24 : vector<32x128xf32>
    %26 = vector.extract_strided_slice %14 {offsets = [0, 0], sizes = [2, 128], strides = [1, 1]} : vector<3x128xf32> to vector<2x128xf32>
    %27 = vector.extract_strided_slice %4 {offsets = [0, 0], sizes = [30, 128], strides = [1, 1]} : vector<32x128xf32> to vector<30x128xf32>
    %28 = tpu.concatenate %26, %27 in 0 : vector<2x128xf32>, vector<30x128xf32> -> vector<32x128xf32>
    %c1 = arith.constant 1 : index
    %c0_18 = arith.constant 0 : index
    %c0_19 = arith.constant 0 : index
    %29 = vector.load %arg4[%c1, %c0_18, %c0_19] : memref<7x32x1xf32, #tpu.memory_space<vmem>>, vector<1x32x1xf32>
    %30 = vector.shape_cast %29 : vector<1x32x1xf32> to vector<32x1xf32>
    %31 = vector.broadcast %30 : vector<32x1xf32> to vector<32x128xf32>
    %32 = arith.mulf %28, %31 : vector<32x128xf32>
    %c0_20 = arith.constant 0 : index
    %c1_21 = arith.constant 1 : index
    %c0_22 = arith.constant 0 : index
    %c0_23 = arith.constant 0 : index
    %33 = vector.load %arg12[%c0_20, %c1_21, %c0_22, %c0_23] : memref<1x7x1x128xf32, #tpu.memory_space<vmem>>, vector<1x1x1x128xf32>
    %34 = vector.shape_cast %33 : vector<1x1x1x128xf32> to vector<1x128xf32>
    %35 = vector.broadcast %34 : vector<1x128xf32> to vector<32x128xf32>
    %36 = arith.mulf %32, %35 : vector<32x128xf32>
    %37 = arith.addf %25, %36 : vector<32x128xf32>
    %38 = vector.extract_strided_slice %14 {offsets = [0, 0], sizes = [1, 128], strides = [1, 1]} : vector<3x128xf32> to vector<1x128xf32>
    %39 = vector.extract_strided_slice %4 {offsets = [0, 0], sizes = [31, 128], strides = [1, 1]} : vector<32x128xf32> to vector<31x128xf32>
    %40 = tpu.concatenate %38, %39 in 0 : vector<1x128xf32>, vector<31x128xf32> -> vector<32x128xf32>
    %c2 = arith.constant 2 : index
    %c0_24 = arith.constant 0 : index
    %c0_25 = arith.constant 0 : index
    %41 = vector.load %arg4[%c2, %c0_24, %c0_25] : memref<7x32x1xf32, #tpu.memory_space<vmem>>, vector<1x32x1xf32>
    %42 = vector.shape_cast %41 : vector<1x32x1xf32> to vector<32x1xf32>
    %43 = vector.broadcast %42 : vector<32x1xf32> to vector<32x128xf32>
    %44 = arith.mulf %40, %43 : vector<32x128xf32>
    %c0_26 = arith.constant 0 : index
    %c2_27 = arith.constant 2 : index
    %c0_28 = arith.constant 0 : index
    %c0_29 = arith.constant 0 : index
    %45 = vector.load %arg12[%c0_26, %c2_27, %c0_28, %c0_29] : memref<1x7x1x128xf32, #tpu.memory_space<vmem>>, vector<1x1x1x128xf32>
    %46 = vector.shape_cast %45 : vector<1x1x1x128xf32> to vector<1x128xf32>
    %47 = vector.broadcast %46 : vector<1x128xf32> to vector<32x128xf32>
    %48 = arith.mulf %44, %47 : vector<32x128xf32>
    %49 = arith.addf %37, %48 : vector<32x128xf32>
    %50 = vector.extract_strided_slice %4 {offsets = [1, 0], sizes = [31, 128], strides = [1, 1]} : vector<32x128xf32> to vector<31x128xf32>
    %51 = vector.extract_strided_slice %14 {offsets = [0, 0], sizes = [1, 128], strides = [1, 1]} : vector<3x128xf32> to vector<1x128xf32>
    %52 = tpu.concatenate %50, %51 in 0 : vector<31x128xf32>, vector<1x128xf32> -> vector<32x128xf32>
    %c4 = arith.constant 4 : index
    %c0_30 = arith.constant 0 : index
    %c0_31 = arith.constant 0 : index
    %53 = vector.load %arg4[%c4, %c0_30, %c0_31] : memref<7x32x1xf32, #tpu.memory_space<vmem>>, vector<1x32x1xf32>
    %54 = vector.shape_cast %53 : vector<1x32x1xf32> to vector<32x1xf32>
    %55 = vector.broadcast %54 : vector<32x1xf32> to vector<32x128xf32>
    %56 = arith.mulf %52, %55 : vector<32x128xf32>
    %c0_32 = arith.constant 0 : index
    %c4_33 = arith.constant 4 : index
    %c0_34 = arith.constant 0 : index
    %c0_35 = arith.constant 0 : index
    %57 = vector.load %arg12[%c0_32, %c4_33, %c0_34, %c0_35] : memref<1x7x1x128xf32, #tpu.memory_space<vmem>>, vector<1x1x1x128xf32>
    %58 = vector.shape_cast %57 : vector<1x1x1x128xf32> to vector<1x128xf32>
    %59 = vector.broadcast %58 : vector<1x128xf32> to vector<32x128xf32>
    %60 = arith.mulf %56, %59 : vector<32x128xf32>
    %61 = arith.addf %49, %60 : vector<32x128xf32>
    %62 = vector.extract_strided_slice %4 {offsets = [2, 0], sizes = [30, 128], strides = [1, 1]} : vector<32x128xf32> to vector<30x128xf32>
    %63 = vector.extract_strided_slice %14 {offsets = [0, 0], sizes = [2, 128], strides = [1, 1]} : vector<3x128xf32> to vector<2x128xf32>
    %64 = tpu.concatenate %62, %63 in 0 : vector<30x128xf32>, vector<2x128xf32> -> vector<32x128xf32>
    %c5 = arith.constant 5 : index
    %c0_36 = arith.constant 0 : index
    %c0_37 = arith.constant 0 : index
    %65 = vector.load %arg4[%c5, %c0_36, %c0_37] : memref<7x32x1xf32, #tpu.memory_space<vmem>>, vector<1x32x1xf32>
    %66 = vector.shape_cast %65 : vector<1x32x1xf32> to vector<32x1xf32>
    %67 = vector.broadcast %66 : vector<32x1xf32> to vector<32x128xf32>
    %68 = arith.mulf %64, %67 : vector<32x128xf32>
    %c0_38 = arith.constant 0 : index
    %c5_39 = arith.constant 5 : index
    %c0_40 = arith.constant 0 : index
    %c0_41 = arith.constant 0 : index
    %69 = vector.load %arg12[%c0_38, %c5_39, %c0_40, %c0_41] : memref<1x7x1x128xf32, #tpu.memory_space<vmem>>, vector<1x1x1x128xf32>
    %70 = vector.shape_cast %69 : vector<1x1x1x128xf32> to vector<1x128xf32>
    %71 = vector.broadcast %70 : vector<1x128xf32> to vector<32x128xf32>
    %72 = arith.mulf %68, %71 : vector<32x128xf32>
    %73 = arith.addf %61, %72 : vector<32x128xf32>
    %74 = vector.extract_strided_slice %4 {offsets = [3, 0], sizes = [29, 128], strides = [1, 1]} : vector<32x128xf32> to vector<29x128xf32>
    %75 = tpu.concatenate %74, %14 in 0 : vector<29x128xf32>, vector<3x128xf32> -> vector<32x128xf32>
    %c6 = arith.constant 6 : index
    %c0_42 = arith.constant 0 : index
    %c0_43 = arith.constant 0 : index
    %76 = vector.load %arg4[%c6, %c0_42, %c0_43] : memref<7x32x1xf32, #tpu.memory_space<vmem>>, vector<1x32x1xf32>
    %77 = vector.shape_cast %76 : vector<1x32x1xf32> to vector<32x1xf32>
    %78 = vector.broadcast %77 : vector<32x1xf32> to vector<32x128xf32>
    %79 = arith.mulf %75, %78 : vector<32x128xf32>
    %c0_44 = arith.constant 0 : index
    %c6_45 = arith.constant 6 : index
    %c0_46 = arith.constant 0 : index
    %c0_47 = arith.constant 0 : index
    %80 = vector.load %arg12[%c0_44, %c6_45, %c0_46, %c0_47] : memref<1x7x1x128xf32, #tpu.memory_space<vmem>>, vector<1x1x1x128xf32>
    %81 = vector.shape_cast %80 : vector<1x1x1x128xf32> to vector<1x128xf32>
    %82 = vector.broadcast %81 : vector<1x128xf32> to vector<32x128xf32>
    %83 = arith.mulf %79, %82 : vector<32x128xf32>
    %84 = arith.addf %73, %83 : vector<32x128xf32>
    %cst_48 = arith.constant dense<0.000000e+00> : vector<32xf32>
    %85 = vector.multi_reduction <add>, %84, %cst_48 [1] : vector<32x128xf32> to vector<32xf32>
    %86 = vector.shape_cast %85 : vector<32xf32> to vector<32x1xf32>
    %cst_49 = arith.constant 6.250000e-02 : f32
    %87 = vector.broadcast %cst_49 : f32 to vector<32x1xf32>
    %88 = arith.mulf %86, %87 : vector<32x1xf32>
    %89 = vector.broadcast %88 : vector<32x1xf32> to vector<32x128xf32>
    %90 = arith.subf %84, %89 : vector<32x128xf32>
    %c0_50 = arith.constant 0 : index
    %c0_51 = arith.constant 0 : index
    %91 = vector.load %arg5[%c0_50, %c0_51] : memref<1x128xf32, #tpu.memory_space<vmem>>, vector<1x128xf32>
    %92 = vector.broadcast %91 : vector<1x128xf32> to vector<32x128xf32>
    %93 = arith.mulf %90, %92 : vector<32x128xf32>
    %94 = arith.mulf %93, %93 : vector<32x128xf32>
    %cst_52 = arith.constant dense<0.000000e+00> : vector<32xf32>
    %95 = vector.multi_reduction <add>, %94, %cst_52 [1] : vector<32x128xf32> to vector<32xf32>
    %96 = vector.shape_cast %95 : vector<32xf32> to vector<32x1xf32>
    %cst_53 = arith.constant 0.0666666701 : f32
    %97 = vector.broadcast %cst_53 : f32 to vector<32x1xf32>
    %98 = arith.mulf %96, %97 : vector<32x1xf32>
    %99 = math.sqrt %98 : vector<32x1xf32>
    %cst_54 = arith.constant 9.99999997E-7 : f32
    %100 = vector.broadcast %cst_54 : f32 to vector<32x1xf32>
    %101 = arith.addf %99, %100 : vector<32x1xf32>
    %102 = arith.truncf %5 : vector<32x128xf32> to vector<32x128xbf16>
    %c0_55 = arith.constant 0 : index
    %c0_56 = arith.constant 0 : index
    %c0_57 = arith.constant 0 : index
    %103 = vector.load %arg14[%c0_55, %c0_56, %c0_57] : memref<1x128x256xbf16, #tpu.memory_space<vmem>>, vector<1x128x256xbf16>
    %104 = vector.shape_cast %103 : vector<1x128x256xbf16> to vector<128x256xbf16>
    %cst_58 = arith.constant dense<0.000000e+00> : vector<32x256xf32>
    %105 = tpu.matmul %102, %104, %cst_58 {dimension_numbers = #tpu.dot_dimension_numbers<[1], [0], [0], [1], [0, 0, 1, 1], [], []>} : vector<32x128xbf16>, vector<128x256xbf16>, vector<32x256xf32> -> vector<32x256xf32>
    %c0_59 = arith.constant 0 : index
    %c0_60 = arith.constant 0 : index
    %c0_61 = arith.constant 0 : index
    %106 = vector.load %arg15[%c0_59, %c0_60, %c0_61] : memref<1x1x256xf32, #tpu.memory_space<vmem>>, vector<1x1x256xf32>
    %107 = vector.shape_cast %106 : vector<1x1x256xf32> to vector<1x256xf32>
    %108 = vector.broadcast %107 : vector<1x256xf32> to vector<32x256xf32>
    %109 = arith.addf %105, %108 : vector<32x256xf32>
    %110 = vector.extract_strided_slice %109 {offsets = [0, 0], sizes = [32, 128], strides = [1, 1]} : vector<32x256xf32> to vector<32x128xf32>
    %111 = vector.extract_strided_slice %109 {offsets = [0, 128], sizes = [32, 128], strides = [1, 1]} : vector<32x256xf32> to vector<32x128xf32>
    %112 = vector.broadcast %101 : vector<32x1xf32> to vector<32x128xf32>
    %113 = arith.divf %93, %112 : vector<32x128xf32>
    %114 = arith.mulf %113, %111 : vector<32x128xf32>
    %115 = arith.addf %114, %110 : vector<32x128xf32>
    %116 = arith.truncf %115 : vector<32x128xf32> to vector<32x128xbf16>
    %c0_62 = arith.constant 0 : index
    %c0_63 = arith.constant 0 : index
    %c0_64 = arith.constant 0 : index
    %117 = vector.load %arg16[%c0_62, %c0_63, %c0_64] : memref<1x128x128xbf16, #tpu.memory_space<vmem>>, vector<1x128x128xbf16>
    %118 = vector.shape_cast %117 : vector<1x128x128xbf16> to vector<128x128xbf16>
    %cst_65 = arith.constant dense<0.000000e+00> : vector<32x128xf32>
    %119 = tpu.matmul %116, %118, %cst_65 {dimension_numbers = #tpu.dot_dimension_numbers<[1], [0], [0], [1], [0, 0, 1, 1], [], []>} : vector<32x128xbf16>, vector<128x128xbf16>, vector<32x128xf32> -> vector<32x128xf32>
    %c0_66 = arith.constant 0 : index
    %c0_67 = arith.constant 0 : index
    %c0_68 = arith.constant 0 : index
    %120 = vector.load %arg17[%c0_66, %c0_67, %c0_68] : memref<1x1x128xf32, #tpu.memory_space<vmem>>, vector<1x1x128xf32>
    %121 = vector.shape_cast %120 : vector<1x1x128xf32> to vector<1x128xf32>
    %122 = vector.broadcast %121 : vector<1x128xf32> to vector<32x128xf32>
    %123 = arith.addf %119, %122 : vector<32x128xf32>
    %cst_69 = arith.constant 5.000000e-01 : f32
    %124 = vector.broadcast %cst_69 : f32 to vector<32x128xf32>
    %125 = arith.mulf %124, %123 : vector<32x128xf32>
    %cst_70 = arith.constant 4.471500e-02 : f32
    %126 = vector.broadcast %cst_70 : f32 to vector<32x128xf32>
    %127 = arith.mulf %126, %123 : vector<32x128xf32>
    %128 = arith.mulf %127, %123 : vector<32x128xf32>
    %129 = arith.mulf %128, %123 : vector<32x128xf32>
    %130 = arith.addf %123, %129 : vector<32x128xf32>
    %cst_71 = arith.constant 0.797884583 : f32
    %131 = vector.broadcast %cst_71 : f32 to vector<32x128xf32>
    %132 = arith.mulf %131, %130 : vector<32x128xf32>
    %133 = math.tanh %132 : vector<32x128xf32>
    %cst_72 = arith.constant 1.000000e+00 : f32
    %134 = vector.broadcast %cst_72 : f32 to vector<32x128xf32>
    %135 = arith.addf %134, %133 : vector<32x128xf32>
    %136 = arith.mulf %125, %135 : vector<32x128xf32>
    %137 = arith.truncf %136 : vector<32x128xf32> to vector<32x128xbf16>
    %c0_73 = arith.constant 0 : index
    %c0_74 = arith.constant 0 : index
    %c0_75 = arith.constant 0 : index
    %138 = vector.load %arg18[%c0_73, %c0_74, %c0_75] : memref<1x128x128xbf16, #tpu.memory_space<vmem>>, vector<1x128x128xbf16>
    %139 = vector.shape_cast %138 : vector<1x128x128xbf16> to vector<128x128xbf16>
    %cst_76 = arith.constant dense<0.000000e+00> : vector<32x128xf32>
    %140 = tpu.matmul %137, %139, %cst_76 {dimension_numbers = #tpu.dot_dimension_numbers<[1], [0], [0], [1], [0, 0, 1, 1], [], []>} : vector<32x128xbf16>, vector<128x128xbf16>, vector<32x128xf32> -> vector<32x128xf32>
    %c0_77 = arith.constant 0 : index
    %c0_78 = arith.constant 0 : index
    %c0_79 = arith.constant 0 : index
    %141 = vector.load %arg19[%c0_77, %c0_78, %c0_79] : memref<1x1x128xf32, #tpu.memory_space<vmem>>, vector<1x1x128xf32>
    %142 = vector.shape_cast %141 : vector<1x1x128xf32> to vector<1x128xf32>
    %143 = vector.broadcast %142 : vector<1x128xf32> to vector<32x128xf32>
    %144 = arith.addf %140, %143 : vector<32x128xf32>
    %c0_80 = arith.constant 0 : index
    %c0_81 = arith.constant 0 : index
    %c0_82 = arith.constant 0 : index
    %145 = vector.load %arg20[%c0_80, %c0_81, %c0_82] : memref<1x1x128xf32, #tpu.memory_space<vmem>>, vector<1x1x128xf32>
    %146 = vector.shape_cast %145 : vector<1x1x128xf32> to vector<1x128xf32>
    %147 = vector.broadcast %146 : vector<1x128xf32> to vector<32x128xf32>
    %148 = arith.mulf %144, %147 : vector<32x128xf32>
    %149 = arith.addf %4, %148 : vector<32x128xf32>
    %c0_83 = arith.constant 0 : index
    %c0_84 = arith.constant 0 : index
    %c0_85 = arith.constant 0 : index
    %150 = vector.load %arg21[%c0_83, %c0_84, %c0_85] : memref<1x32x128xf32, #tpu.memory_space<vmem>>, vector<1x32x128xf32>
    %151 = vector.shape_cast %150 : vector<1x32x128xf32> to vector<32x128xf32>
    %152 = vector.shape_cast %149 : vector<32x128xf32> to vector<1x32x128xf32>
    tpu.vector_store %arg21[%c0_83, %c0_84, %c0_85], %152 {strides = array<i32>} : memref<1x32x128xf32, #tpu.memory_space<vmem>>, vector<1x32x128xf32>,
    return
  }
  func.func @transform_0(%arg0: i32, %arg1: i32) -> (i32, i32, i32) {
    %c0_i32 = arith.constant 0 : i32
    %c0_i32_0 = arith.constant 0 : i32
    %c0_i32_1 = arith.constant 0 : i32
    return %arg0, %c0_i32, %c0_i32_0 : i32, i32, i32
  }
  func.func @transform_1(%arg0: i32, %arg1: i32) -> (i32, i32, i32) {
    %c0_i32 = arith.constant 0 : i32
    %c0_i32_0 = arith.constant 0 : i32
    %c0_i32_1 = arith.constant 0 : i32
    return %arg0, %c0_i32, %c0_i32_0 : i32, i32, i32
  }
  func.func @transform_2(%arg0: i32, %arg1: i32) -> (i32, i32, i32) {
    %c0_i32 = arith.constant 0 : i32
    %c0_i32_0 = arith.constant 0 : i32
    %c0_i32_1 = arith.constant 0 : i32
    %c0_i32_2 = arith.constant 0 : i32
    return %c0_i32, %c0_i32_0, %c0_i32_1 : i32, i32, i32
  }
  func.func @transform_3(%arg0: i32, %arg1: i32) -> (i32, i32) {
    %c0_i32 = arith.constant 0 : i32
    %c0_i32_0 = arith.constant 0 : i32
    %c0_i32_1 = arith.constant 0 : i32
    return %c0_i32, %c0_i32_0 : i32, i32
  }
  func.func @transform_4(%arg0: i32, %arg1: i32) -> (i32, i32) {
    %c0_i32 = arith.constant 0 : i32
    %c0_i32_0 = arith.constant 0 : i32
    %c0_i32_1 = arith.constant 0 : i32
    return %c0_i32, %c0_i32_0 : i32, i32
  }
  func.func @transform_5(%arg0: i32, %arg1: i32) -> (i32, i32) {
    %c0_i32 = arith.constant 0 : i32
    %c0_i32_0 = arith.constant 0 : i32
    %c0_i32_1 = arith.constant 0 : i32
    return %c0_i32, %c0_i32_0 : i32, i32
  }
  func.func @transform_6(%arg0: i32, %arg1: i32) -> (i32, i32) {
    %c0_i32 = arith.constant 0 : i32
    %c0_i32_0 = arith.constant 0 : i32
    %c0_i32_1 = arith.constant 0 : i32
    return %c0_i32, %c0_i32_0 : i32, i32
  }
  func.func @transform_7(%arg0: i32, %arg1: i32) -> (i32, i32) {
    %c0_i32 = arith.constant 0 : i32
    %c0_i32_0 = arith.constant 0 : i32
    %c0_i32_1 = arith.constant 0 : i32
    return %c0_i32, %c0_i32_0 : i32, i32
  }
  func.func @transform_8(%arg0: i32, %arg1: i32) -> (i32, i32) {
    %c0_i32 = arith.constant 0 : i32
    %c0_i32_0 = arith.constant 0 : i32
    %c0_i32_1 = arith.constant 0 : i32
    return %c0_i32, %c0_i32_0 : i32, i32
  }
  func.func @transform_9(%arg0: i32, %arg1: i32) -> (i32, i32) {
    %c0_i32 = arith.constant 0 : i32
    %c0_i32_0 = arith.constant 0 : i32
    %c0_i32_1 = arith.constant 0 : i32
    return %c0_i32, %c0_i32_0 : i32, i32
  }
  func.func @transform_10(%arg0: i32, %arg1: i32) -> (i32, i32, i32, i32) {
    %c0_i32 = arith.constant 0 : i32
    %c0_i32_0 = arith.constant 0 : i32
    %c0_i32_1 = arith.constant 0 : i32
    %c0_i32_2 = arith.constant 0 : i32
    return %arg1, %c0_i32, %c0_i32_0, %c0_i32_1 : i32, i32, i32, i32
  }
  func.func @transform_11(%arg0: i32, %arg1: i32) -> (i32, i32, i32) {
    %c0_i32 = arith.constant 0 : i32
    %c0_i32_0 = arith.constant 0 : i32
    %c0_i32_1 = arith.constant 0 : i32
    return %arg1, %c0_i32, %c0_i32_0 : i32, i32, i32
  }
  func.func @transform_12(%arg0: i32, %arg1: i32) -> (i32, i32, i32) {
    %c0_i32 = arith.constant 0 : i32
    %c0_i32_0 = arith.constant 0 : i32
    %c0_i32_1 = arith.constant 0 : i32
    return %arg1, %c0_i32, %c0_i32_0 : i32, i32, i32
  }
  func.func @transform_13(%arg0: i32, %arg1: i32) -> (i32, i32, i32) {
    %c0_i32 = arith.constant 0 : i32
    %c0_i32_0 = arith.constant 0 : i32
    %c0_i32_1 = arith.constant 0 : i32
    return %arg1, %c0_i32, %c0_i32_0 : i32, i32, i32
  }
  func.func @transform_14(%arg0: i32, %arg1: i32) -> (i32, i32, i32) {
    %c0_i32 = arith.constant 0 : i32
    %c0_i32_0 = arith.constant 0 : i32
    %c0_i32_1 = arith.constant 0 : i32
    return %arg1, %c0_i32, %c0_i32_0 : i32, i32, i32
  }
  func.func @transform_15(%arg0: i32, %arg1: i32) -> (i32, i32, i32) {
    %c0_i32 = arith.constant 0 : i32
    %c0_i32_0 = arith.constant 0 : i32
    %c0_i32_1 = arith.constant 0 : i32
    return %arg1, %c0_i32, %c0_i32_0 : i32, i32, i32
  }
  func.func @transform_16(%arg0: i32, %arg1: i32) -> (i32, i32, i32) {
    %c0_i32 = arith.constant 0 : i32
    %c0_i32_0 = arith.constant 0 : i32
    %c0_i32_1 = arith.constant 0 : i32
    return %arg1, %c0_i32, %c0_i32_0 : i32, i32, i32
  }
  func.func @transform_17(%arg0: i32, %arg1: i32) -> (i32, i32, i32) {
    %c0_i32 = arith.constant 0 : i32
    %c0_i32_0 = arith.constant 0 : i32
    %c0_i32_1 = arith.constant 0 : i32
    return %arg1, %c0_i32, %c0_i32_0 : i32, i32, i32
  }
  func.func @transform_18(%arg0: i32, %arg1: i32) -> (i32, i32, i32) {
    %c0_i32 = arith.constant 0 : i32
    %c0_i32_0 = arith.constant 0 : i32
    %c0_i32_1 = arith.constant 0 : i32
    return %arg1, %c0_i32, %c0_i32_0 : i32, i32, i32
  }
  func.func @transform_19(%arg0: i32, %arg1: i32) -> (i32, i32, i32) {
    %c0_i32 = arith.constant 0 : i32
    %c0_i32_0 = arith.constant 0 : i32
    %c0_i32_1 = arith.constant 0 : i32
    return %arg0, %c0_i32, %c0_i32_0 : i32, i32, i32
  }
}

</mosaic_0001>

<bundles_post_ra>
// kernel: tpu_custom_call.1
= control target key start
LH: loop header
LB: loop body
LE: loop exit
PB: predicated region body
PF: predicated region fallthrough
CT: control target
= control target key end

     0   :  { %s4478_s0 = inlined_call_operand.hbm [shape: f32[1,32,128], index: 0, kind: input, shape index: {}]   ;;  %s4479_s1 = inlined_call_operand.vmem [shape: f32[1,32,1], index: 1, kind: input, shape index: {}]   ;;  %s4480_s2 = inlined_call_operand.vmem [shape: f32[7,32,1], index: 2, kind: input, shape index: {}]   ;;  %s4481_s3 = inlined_call_operand.vmem [shape: f32[1,128], index: 3, kind: input, shape index: {}]   ;;  %s4482_s4 = inlined_call_operand.hbm [shape: bf16[128,128], index: 4, kind: input, shape index: {}]   ;;  %s4483_s5 = inlined_call_operand.vmem [shape: f32[1,128], index: 5, kind: input, shape index: {}]   ;;  %s4484_s6 = inlined_call_operand.vmem [shape: f32[1,128], index: 6, kind: input, shape index: {}]   ;;  %s4485_s7 = inlined_call_operand.hbm [shape: f32[1,128], index: 7, kind: input, shape index: {}]   ;;  %s4486_s8 = inlined_call_operand.hbm [shape: bf16[128,128], index: 8, kind: input, shape index: {}]   ;;  %s4487_s9 = inlined_call_operand.hbm [shape: f32[1,128], index: 9, kind: input, shape index: {}]   ;;  %s4488_s10 = inlined_call_operand.vmem [shape: f32[2,7,1,128], index: 10, kind: input, shape index: {}]   ;;  %s4489_s11 = inlined_call_operand.vmem [shape: f32[2,1,128], index: 11, kind: input, shape index: {}]   ;;  %s4490_s12 = inlined_call_operand.vmem [shape: bf16[2,128,256], index: 12, kind: input, shape index: {}]   ;;  %s4491_s13 = inlined_call_operand.vmem [shape: f32[2,1,256], index: 13, kind: input, shape index: {}]   ;;  %s4492_s14 = inlined_call_operand.hbm [shape: bf16[2,128,128], index: 14, kind: input, shape index: {}]   ;;  %s4493_s15 = inlined_call_operand.vmem [shape: f32[2,1,128], index: 15, kind: input, shape index: {}]   ;;  %s4494_s16 = inlined_call_operand.hbm [shape: bf16[2,128,128], index: 16, kind: input, shape index: {}]   ;;  %s4495_s17 = inlined_call_operand.vmem [shape: f32[2,1,128], index: 17, kind: input, shape index: {}]   ;;  %s4496_s18 = inlined_call_operand.vmem [shape: f32[2,1,128], index: 18, kind: input, shape index: {}]   ;;  %s4497_s19 = inlined_call_operand.hbm [shape: f32[1,32,128], index: 19, kind: output, shape index: {}]  }
   0x1   :  { %4511 = sst [smem:[#allocation25_spill]] %s4478_s0 }
   0x2   :  { %4512 = sst [smem:[#allocation26_spill]] %s4479_s1 }
   0x3   :  { %4513 = sst [smem:[#allocation27_spill]] %s4480_s2 }
   0x4   :  { %4514 = sst [smem:[#allocation28_spill]] %s4481_s3 }
   0x5   :  { %4515 = sst [smem:[#allocation29_spill]] %s4482_s4 }
   0x6   :  { %4516 = sst [smem:[#allocation30_spill]] %s4483_s5 }
   0x7   :  { %4517 = sst [smem:[#allocation31_spill]] %s4484_s6 }
   0x8   :  { %4518 = sst [smem:[#allocation32_spill]] %s4485_s7 }
   0x9   :  { %4519 = sst [smem:[#allocation33_spill]] %s4486_s8 }
   0xa   :  { %4520 = sst [smem:[#allocation34_spill]] %s4487_s9 }
   0xb   :  { %4521 = sst [smem:[#allocation35_spill]] %s4488_s10 }
   0xc   :  { %4522 = sst [smem:[#allocation36_spill]] %s4490_s12 }
   0xd   :  { %4523 = sst [smem:[#allocation37_spill]] %s4491_s13 }
   0xe   :  { %4524 = sst [smem:[#allocation38_spill]] %s4492_s14 }
   0xf   :  { %4525 = sst [smem:[#allocation39_spill]] %s4493_s15 }
  0x10   :  { %4526 = sst [smem:[#allocation40_spill]] %s4494_s16 }
  0x11   :  { %4527 = sst [smem:[#allocation41_spill]] %s4495_s17 }
  0x12   :  { %4528 = sst [smem:[#allocation42_spill]] %s4496_s18 }
  0x13   :  { %4529 = sst [smem:[#allocation43_spill]] %s4497_s19 }
  0x14   :  { %24 = vsyncpa [#allocation4], 0 }
  0x15   :  { %25 = vsyncpa [#allocation7], 0 }
  0x16   :  { %26 = vsyncpa [#allocation10], 0 }
  0x17   :  { %27 = vsyncpa [#allocation13], 0 }
  0x18   :  { %29 = vsyncpa [#allocation13 + $0x1], 0 }
  0x19   :  { %30 = vsyncpa [#allocation5], 0  ;;  %s3668_s0 = smov 0   ;;  %s3670_s30 = smov 0  }
  0x1a   :  { %s3672_s20 = smov 0   ;;  %s3674_s21 = smov 0  }
  0x1b   :  { %s3676_s1 = smov 0   ;;  %s3678_s22 = smov 0  }
  0x1c LB: > { %4530 = sst [smem:[#allocation21_spill]] %s3532_s20  ;;  %s3546_s2 = smov [#allocation6]   ;;  %s3544_s22 = sphi %s3678_s22, %s36_s22   ;;  %s3540_s1 = sphi %s3676_s1, %s4588_s1   ;;  %s3536_s21 = sphi %s3674_s21, %s4584_s21   ;;  %s3532_s20 = sphi %s3672_s20, %s4583_s20   ;;  %s3528_s30 = sphi %s3670_s30, %s4587_s30   ;;  %s3524_s0 = sphi %s3668_s0, %s4586_s0  }
  0x1d   : > { %4531 = sst [smem:[#allocation22_spill]] %s3540_s1  ;;  %s575_s23 = sshll.u32 %s3546_s2, 4  ;;  %s576_s23 = int_to_ptr.vmem [resolvable:$true] %s575_s23 }
  0x1e   : > { %s3699_s24 = sadd.s32 4294967295, %s3544_s22   ;;  %p2760_p0 = scmp.ge.s32.totalorder %s3544_s22, 1 }
  0x1f   : > { %p4506_p1 = scmp.eq.s32.totalorder %s3699_s24, 0  ;;  %p533_p2 = scmp.lt.s32.totalorder %s3544_s22, 3 }
  0x20   : > { %s3547_s3 = smov [#allocation9]   ;;  %s3279_s29 = scalar_lea.vmem %s576_s23, 1024 }
  0x21   : > { %p3704_p3 = pnand %p2760_p0, %p533_p2  ;;  %s605_s26 = sshll.u32 %s3547_s3, 4  ;;  %s606_s26 = int_to_ptr.vmem [resolvable:$true] %s605_s26 }
  0x22   : > { %p3280_p7 = scmp.ne.s32.totalorder %s576_s23, %s3279_s29  ;;  %p3287_p10 = scmp.lt.s32.totalorder %s576_s23, %s576_s23 }
  0x23   : > { %s4532_s25 = scalar_select %p3704_p3, 1, 0 }
  0x24   : > { %p3064_p4 = pneg %p3704_p3  ;;  %p3288_p11 = scmp.lt.s32.totalorder %s3279_s29, %s3279_s29 }
  0x26   : > { %p3712_p5 = pnand %p3064_p4, %p4506_p1  ;;  %p3289_p12 = por %p3288_p11, %p3287_p10 }
  0x28   : > { %p3718_p6 = pneg %p3712_p5 }
  0x2a   : > { %p3282_p8 = pnand %p3280_p7, %p3718_p6 }
  0x2c   : > { %p3283_p9 = pneg %p3282_p8 }
  0x2e   : > { %p3290_p13 = pnand %p3289_p12, %p3283_p9 }
  0x30   : > { %3293 = shalt.err (!%p3290_p13)
}
  0x31   : > { %s4500_s2 = smov 64   ;;  %s4502_s3 = smov 4  }
  0x32   : > { %s4535_s4 = sld [smem:[#allocation29_spill]]  ;;  %s3305_s6 = scalar_lea.vmem %s606_s26, 1024 }
  0x33   : > { %p3306_p0 = scmp.ne.s32.totalorder %s606_s26, %s3305_s6  ;;  %p3313_p7 = scmp.lt.s32.totalorder %s606_s26, %s606_s26 }
  0x34   : > { %p3314_p8 = scmp.lt.s32.totalorder %s3305_s6, %s3305_s6 }
  0x35   : > { %p3308_p2 = pnand %p3306_p0, %p3718_p6 }
  0x36   : > { %p3315_p9 = por %p3314_p8, %p3313_p7 }
  0x37   : > { %p3309_p4 = pneg %p3308_p2 }
  0x38   : > { %3070 = dma.hbm_to_vmem [thread:$0]  (!%p3712_p5), %s4535_s4, 1024, %s576_s23, [#allocation7], %s4500_s2, %s4500_s2, %s4502_s3  }
  0x39   : > { %p3316_p10 = pnand %p3315_p9, %p3309_p4 }
  0x3b   : > { %3319 = shalt.err (!%p3316_p10)
}
  0x3c   : > { %s4536_s8 = sld [smem:[#allocation33_spill]]  ;;  %s45_s5 = sadd.s32 1, %s3540_s1 }
  0x3d   : > { %s379_s6 = sadd.s32 1, %s3532_s20  ;;  %p46_p11 = scmp.ge.s32.totalorder %s45_s5, 2 }
  0x3e   : > { %p386_p12 = scmp.ne.s32.totalorder %s3532_s20, %s3528_s30  ;;  %p387_p13 = scmp.eq.s32.totalorder %s3544_s22, 0 }
  0x3f   : > { %p392_p0 = scmp.ne.s32.totalorder %s3528_s30, %s3524_s0  ;;  %s4590_s5 = smov (%p46_p11, %s45_s5), 0 }
  0x40   : > { %4537 = sst [smem:[#allocation23_spill]] %s4590_s5  ;;  %p3751_p2 = por %p387_p13, %p386_p12 }
  0x41   : > { %p3757_p4 = por %p4506_p1, %p392_p0  ;;  %s376_s23 = ssub.s32 %s3540_s1, %s4590_s5 }
  0x42   : > { %3076 = dma.hbm_to_vmem [thread:$0]  (!%p3712_p5), %s4536_s8, 1024, %s606_s26, [#allocation10], %s4500_s2, %s4500_s2, %s4502_s3  }
  0x43   : > { %s4539_s19 = scalar_select %p3757_p4, 1, 0 }
  0x44   : > { %p3092_p7 = scmp.lt.s32.totalorder %s3544_s22, 2  ;;  %p377_p8 = scmp.eq.s32.totalorder %s376_s23, 0 }
  0x45   : > { %s658_s26 = sand.u32 1, %s3544_s22   ;;  %s660_s29 = sand.u32 1, %s3532_s20  }
  0x46   : > { %s3767_s2 = scalar_select %p377_p8, %s3532_s20, %s379_s6  }
  0x47   : > { %s2768_s0 = sshll.u32 %s660_s29, 6  ;;  %s2896_s3 = sshll.u32 %s3540_s1, 10 }
  0x48   : > { %4540 = sst [smem:[#allocation24_spill]] %s3767_s2  ;;  %s662_s15 = scalar_lea.vmem [#allocation12], %s2768_s0 }
  0x49   : > { %s4541_s14 = sld [smem:[#allocation38_spill]]  ;;  %s669_s13 = sshll.u32 %s662_s15, 4  ;;  %s670_s13 = int_to_ptr.vmem [resolvable:$true] %s669_s13 }
  0x4a   : > { %p3775_p9 = pnand %p3092_p7, %p3751_p2  ;;  %s4543_s16 = sld [smem:[#allocation40_spill]] }
  0x4b   : > { %s3784_s29 = scalar_lea.sflag [#allocation13], %s658_s26  ;;  %s3333_s4 = scalar_lea.vmem %s670_s13, 1024 }
  0x4c   : > { %p4507_p10 = pneg %p3775_p9  ;;  %p3334_p11 = scmp.ne.s32.totalorder %s670_s13, %s3333_s4 }
  0x4d   : > { %s3550_s8 = smov [#allocation12]  }
  0x4e   : > { %p3336_p12 = pnand %p3334_p11, %p4507_p10  ;;  %s3338_s15 = sshll.u32 %s3550_s8, 4  ;;  %s3339_s15 = int_to_ptr.vmem [resolvable:$false] %s3338_s15 }
  0x4f   : > { %s668_s17 = scalar_lea.hbm %s4541_s14, %s2896_s3  ;;  %s3340_s18 = scalar_lea.vmem %s3339_s15, 2048 }
  0x50   : > { %s3782_s6 = scalar_lea.hbm %s4543_s16, %s2896_s3  ;;  %p3337_p13 = pneg %p3336_p12 }
  0x51   : > { %p3341_p0 = scmp.lt.s32.totalorder %s670_s13, %s3339_s15  ;;  %p3342_p2 = scmp.lt.s32.totalorder %s3340_s18, %s3333_s4 }
  0x53   : > { %p3343_p7 = por %p3342_p2, %p3341_p0 }
  0x55   : > { %p3344_p8 = pnand %p3343_p7, %p3337_p13 }
  0x57   : > { %3347 = shalt.err (!%p3344_p8)
}
  0x58   : > { %s4544_s3 = smov 4   ;;  %s4545_s5 = smov 64  }
  0x59   : > { %3083 = dma.hbm_to_vmem [thread:$0]  (!%p3775_p9), %s668_s17, 1024, %s670_s13, %s3784_s29, %s4545_s5, %s4545_s5, %s4544_s3  }
  0x5a   : > { %s689_s26 = scalar_lea.vmem [#allocation14], %s2768_s0  ;;  %s3551_s8 = smov [#allocation3]  }
  0x5b   : > { %s696_s23 = sshll.u32 %s689_s26, 4  ;;  %s548_s14 = sshll.u32 %s3551_s8, 4  ;;  %s3797_s23 = int_to_ptr.vmem [resolvable:$true] %s696_s23  ;;  %s549_s14 = int_to_ptr.vmem [resolvable:$true] %s548_s14 }
  0x5c   : > { %s3359_s15 = scalar_lea.vmem %s549_s14, 512  ;;  %p3367_p0 = scmp.lt.s32.totalorder %s549_s14, %s549_s14 }
  0x5d   : > { %p3360_p11 = scmp.ne.s32.totalorder %s549_s14, %s3359_s15  ;;  %p3368_p2 = scmp.lt.s32.totalorder %s3359_s15, %s3359_s15 }
  0x5f   : > { %p3362_p12 = pnand %p3360_p11, %p3718_p6  ;;  %p3369_p7 = por %p3368_p2, %p3367_p0 }
  0x61   : > { %p3363_p13 = pneg %p3362_p12 }
  0x63   : > { %p3370_p8 = pnand %p3369_p7, %p3363_p13 }
  0x65   : > { %3373 = shalt.err (!%p3370_p8)
}
  0x66   : > { %s3552_s4 = smov 128   ;;  %s3553_s13 = smov 8  }
  0x67   : > { %s4546_s18 = sld [smem:[#allocation25_spill]]  ;;  %s3554_s26 = smov [#allocation8]  }
  0x68   : > { %s595_s8 = sshll.u32 %s3554_s26, 4  ;;  %s3555_s16 = smov [#allocation11]   ;;  %s596_s8 = int_to_ptr.vmem [resolvable:$true] %s595_s8 }
  0x69   : > { %s619_s1 = sshll.u32 %s3555_s16, 4  ;;  %s3385_s2 = scalar_lea.vmem %s596_s8, 16  ;;  %s620_s1 = int_to_ptr.vmem [resolvable:$true] %s619_s1 }
  0x6a   : > { %p3386_p11 = scmp.ne.s32.totalorder %s596_s8, %s3385_s2  ;;  %s3392_s15 = scalar_lea.vmem %s596_s8, 32 }
  0x6b   : > { %p3393_p0 = scmp.lt.s32.totalorder %s596_s8, %s596_s8  ;;  %p3394_p2 = scmp.lt.s32.totalorder %s3392_s15, %s3385_s2 }
  0x6c   : > { %p3388_p12 = pnand %p3386_p11, %p3718_p6 }
  0x6d   : > { %3067 = dma.hbm_to_vmem [thread:$0]  (!%p3712_p5), %s4546_s18, 512, %s549_s14, [#allocation4], %s3552_s4, %s3552_s4, %s3553_s13  }
  0x6e   : > { %p3389_p13 = pneg %p3388_p12  ;;  %p3395_p7 = por %p3394_p2, %p3393_p0 }
  0x70   : > { %p3396_p8 = pnand %p3395_p7, %p3389_p13 }
  0x72   : > { %3399 = shalt.err (!%p3396_p8)
}
  0x73   : > { %s4547_s7 = sld [smem:[#allocation32_spill]]  ;;  %s3411_s16 = scalar_lea.vmem %s620_s1, 16 }
  0x74   : > { %p3412_p1 = scmp.ne.s32.totalorder %s620_s1, %s3411_s16  ;;  %s3418_s4 = scalar_lea.vmem %s620_s1, 32 }
  0x75   : > { %p3419_p12 = scmp.lt.s32.totalorder %s620_s1, %s620_s1  ;;  %p3420_p4 = scmp.lt.s32.totalorder %s3418_s4, %s3411_s16 }
  0x76   : > { %p3414_p10 = pnand %p3412_p1, %p3718_p6 }
  0x77   : > { %p3421_p3 = por %p3420_p4, %p3419_p12 }
  0x78   : > { %p3415_p11 = pneg %p3414_p10 }
  0x79   : > { %3073 = dma.hbm_to_vmem [thread:$0]  (!%p3712_p5), %s4547_s7, 16, %s596_s8, [#allocation7]  }
  0x7a   : > { %p3422_p0 = pnand %p3421_p3, %p3415_p11 }
  0x7c   : > { %3425 = shalt.err (!%p3422_p0)
}
  0x7d   : > { %s4548_s9 = sld [smem:[#allocation34_spill]]  ;;  %s3439_s0 = scalar_lea.vmem %s3797_s23, 1024 }
  0x7e   : > { %p3440_p13 = scmp.ne.s32.totalorder %s3797_s23, %s3439_s0  ;;  %p4549_p1 = pneg %p3775_p9 }
  0x7f   : > { %s3556_s28 = smov [#allocation14]  }
  0x80   : > { %p3442_p6 = pnand %p3440_p13, %p4549_p1  ;;  %s3444_s18 = sshll.u32 %s3556_s28, 4  ;;  %s3445_s18 = int_to_ptr.vmem [resolvable:$false] %s3444_s18 }
  0x81   : > { %s3446_s26 = scalar_lea.vmem %s3445_s18, 2048  ;;  %p3447_p3 = scmp.lt.s32.totalorder %s3797_s23, %s3445_s18 }
  0x82   : > { %p3443_p10 = pneg %p3442_p6  ;;  %p3448_p4 = scmp.lt.s32.totalorder %s3446_s26, %s3439_s0 }
  0x83   : > { %3079 = dma.hbm_to_vmem [thread:$0]  (!%p3712_p5), %s4548_s9, 16, %s620_s1, [#allocation10]  }
  0x84   : > { %p3449_p2 = por %p3448_p4, %p3447_p3 }
  0x86   : > { %p3450_p7 = pnand %p3449_p2, %p3443_p10 }
  0x88   : > { %3453 = shalt.err (!%p3450_p7)
}
  0x89   : > { %3086 = dma.hbm_to_vmem [thread:$0]  (!%p3775_p9), %s3782_s6, 1024, %s3797_s23, %s3784_s29, %s4545_s5, %s4545_s5, %s4544_s3  }
  0x8a   : > { %p4550_p5 = scmp.ne.s32.totalorder %s4532_s25, 0 }
  0x8b   : > { %p4551_p8 = scmp.eq.s32.totalorder (!%p4550_p5), %s3699_s24, 0 }
  0x8c   : > { %720 = sbr.rel (%p4550_p5) target bundleno = 1594 (0x63a), region = 96 }
  0x91   : > { %3503 = dma.done.wait (%p4551_p8), [#allocation4], 512   ;;  %p4552_p11 = pmov %p4551_p8 }
  0x92   : > { %p4553_p12 = pmov %p4551_p8 }
  0x93   : > { %3505 = vsyncadd (%p4552_p11), [#allocation4], 4294966784 }
  0x94   : > { %3507 = dma.done.wait (%p4553_p12), [#allocation7], 1040   ;;  %p4554_p0 = pmov %p4551_p8 }
  0x96   : > { %3509 = vsyncadd (%p4554_p0), [#allocation7], 4294966256  ;;  %p4555_p13 = pmov %p4554_p0 }
  0x97   : > { %p4556_p9 = pmov %p4554_p0 }
  0x98   : > { %3511 = dma.done.wait (%p4555_p13), [#allocation10], 1040  }
  0x99   : > { %3513 = vsyncadd (%p4556_p9), [#allocation10], 4294966256  ;;  %s742_s12 = sand.u32 1, %s3699_s24   ;;  %s744_s1 = sand.u32 1, %s3528_s30  }
  0x9a   : > { %s2780_s25 = sshll.u32 %s744_s1, 6  ;;  %s743_s27 = scalar_lea.sflag [#allocation13], %s742_s12 }
  0x9b   : > { %s3850_s6 = scalar_lea.vmem [#allocation12], %s2780_s25  ;;  %p4557_p1 = scmp.ne.s32.totalorder %s4539_s19, 0 }
  0x9d   : > { %3515 = dma.done.wait (%p4557_p1), %s743_s27, 2048  }
  0x9e   : > { %3517 = vsyncadd (%p4557_p1), %s743_s27, 4294965248  ;;  %p845_p6 = scmp.lt.s32.totalorder %s3536_s21, 1  ;;  %s4558_s10 = sld [smem:[#allocation35_spill]] }
  0x9f   : > { %s4559_s13 = sld [smem:[#allocation36_spill]]  ;;  %s3894_s4 = scalar_lea.vmem [#allocation14], %s2780_s25 }
  0xa0   : > { %s3858_s29 = scalar_select %p845_p6, %s3536_s21, 1 }
  0xa1   : > { %s4560_s26 = sld [smem:[#allocation37_spill]]  ;;  %p2785_p10 = scmp.ne.s32.totalorder %s3536_s21, 0 }
  0xa2   : > { %s3019_s3 = smul.u32 7, %s3858_s29  ;;  %s2898_s15 = sshll.u32 %s3858_s29, 7 }
  0xa3   : > { %s2784_s19 = sshll.u32 %s3858_s29, 1  ;;  %s4561_s5 = sld [smem:[#allocation39_spill]] }
  0xa4   : > { %s3870_s16 = scalar_lea.vmem %s4558_s10, %s3019_s3  ;;  %s4562_s9 = sld [smem:[#allocation41_spill]] }
  0xa5   : > { %s3875_s0 = scalar_lea.vmem %s4559_s13, %s2898_s15  ;;  %s4563_s10 = sld [smem:[#allocation42_spill]] }
  0xa6   : > { %s4564_s2 = sld [smem:[#allocation26_spill]] (!%p2785_p10) }
  0xa7   : > { %s3880_s12 = scalar_lea.vmem %s4560_s26, %s2784_s19  ;;  %874 = sbr.rel (%p2785_p10) target bundleno = 632 (0x278), region = 128 }
  0xa8   : > { %s4565_s18 = sld [smem:[#allocation31_spill]] (!%p2785_p10) }
  0xa9   : > { %s863_s23 = scalar_lea.vmem %s4561_s5, %s3858_s29  ;;  %s4574_s27 = sld [smem:[#allocation30_spill]] (!%p2785_p10) }
  0xaa   : > { %s866_s17 = scalar_lea.vmem %s4562_s9, %s3858_s29 }
  0xab   : > { %s869_s20 = scalar_lea.vmem %s4563_s10, %s3858_s29 }
  0xac   : > { %v1007_v0 = vld [vmem:[%s4564_s2 + $0x10] sm:$0xff]  ;;  %v1005_v1 = vld [vmem:[%s4564_s2] sm:$0xff]  ;;  %v3557_v2 = vmov 0   ;;  %v1008_v3 = vld [vmem:[%s4564_s2 + $0x18] sm:$0xff] }
  0xad   : > { %3169 = vset.pattern.permute.xlu1 %v3557_v2  ;;  %3168 = vset.pattern.permute.xlu0 %v3557_v2  ;;  %v1006_v4 = vld [vmem:[%s4564_s2 + $0x8] sm:$0xff]  ;;  %v3170_v5 = vld [vmem:[#allocation6 + $0x38] sm:$0xff]   ;;  %v3171_v6 = vld [vmem:[#allocation6 + $0x30] sm:$0xff]  }
  0xae   : > { %1022 = vperm.xlu1 %3169, %v1007_v0   ;;  %1012 = vperm.xlu0 %3168, %v1005_v1   ;;  %v3172_v7 = vld [vmem:[#allocation9 + $0x38] sm:$0xff]   ;;  %v3173_v8 = vld [vmem:[#allocation6 + $0x28] sm:$0xff]   ;;  %v3174_v9 = vld [vmem:[#allocation9 + $0x30] sm:$0xff]  }
  0xaf   : > { %2939 = vmatprep.subr.bf16.mxu0 %v3170_v5  ;;  %2959 = vmatprep.subr.bf16.mxu1 %v3172_v7  ;;  %v3176_v10 = vld [vmem:[#allocation9 + $0x28] sm:$0xff]   ;;  %v875_v11 = vld [vmem:[#allocation3] sm:$0xff]  ;;  %v3177_v16 = vld [vmem:[#allocation6 + $0x18] sm:$0xff]  }
  0xb0   : > { %2940 = vmatpush3.bf16.msra.mxu0 %v3170_v5  ;;  %2960 = vmatpush3.bf16.msra.mxu1 %v3172_v7  ;;  %v3175_v12 = vld [vmem:[#allocation6 + $0x20] sm:$0xff]   ;;  %v876_v13 = vld [vmem:[#allocation3 + $0x8] sm:$0xff]  ;;  %v3179_v18 = vld [vmem:[#allocation6 + $0x10] sm:$0xff]  }
  0xb1   : > { %2941 = vmatprep.subr.bf16.mxu0 %v3171_v6  ;;  %2961 = vmatprep.subr.bf16.mxu1 %v3174_v9  ;;  %v879_v14 = vpack.c.bf16 %v876_v13, %v875_v11  ;;  %v3178_v15 = vld [vmem:[#allocation9 + $0x20] sm:$0xff]   ;;  %v3180_v17 = vld [vmem:[#allocation9 + $0x18] sm:$0xff]   ;;  %v3182_v19 = vld [vmem:[#allocation9 + $0x10] sm:$0xff]  }
  0xb2   : > { %1027 = vperm.xlu1 %3169, %v1008_v3   ;;  %1017 = vperm.xlu0 %3168, %v1006_v4   ;;  %v3181_v20 = vld [vmem:[#allocation6 + $0x8] sm:$0xff]   ;;  %v3183_v22 = vld [vmem:[#allocation6] sm:$0xff]   ;;  %v877_v23 = vld [vmem:[#allocation3 + $0x10] sm:$0xff]  ;;  %v3558_v4 = vmov 683565275  }
  0xb3   : > { %2955 = vmatprep.mubr.bf16.mxu0 %v879_v14  ;;  %v3184_v21 = vld [vmem:[#allocation9 + $0x8] sm:$0xff]   ;;  %v878_v24 = vld [vmem:[#allocation3 + $0x18] sm:$0xff]  ;;  %v3185_v25 = vld [vmem:[#allocation9] sm:$0xff]   ;;  %v3562_v14 = vmov 920167782  }
  0xb4   : > { %2942 = vmatpush3.bf16.msra.mxu0 %v3171_v6  ;;  %2962 = vmatpush3.bf16.msra.mxu1 %v3174_v9  ;;  %v880_v26 = vpack.c.bf16 %v878_v24, %v877_v23  ;;  %v2795_v27 = vld [vmem:[%s4565_s18] ss:$0 sm:$0xff] }
  0xb5   : > { %2943 = vmatprep.subr.bf16.mxu0 %v3173_v8  ;;  %2963 = vmatprep.subr.bf16.mxu1 %v3176_v10  ;;  %v2796_v28 = vld [vmem:[#allocation8] ss:$0 sm:$0xff] }
  0xb8   : > { %2944 = vmatpush3.bf16.msra.mxu0 %v3173_v8  ;;  %2964 = vmatpush3.bf16.msra.mxu1 %v3176_v10  ;;  %v3559_v8 = vmov 2475754826   ;;  %v3560_v10 = vmov 2131351028  }
  0xb9   : > { %2945 = vmatprep.subr.bf16.mxu0 %v3175_v12  ;;  %2965 = vmatprep.subr.bf16.mxu1 %v3178_v15 }
  0xbc   : > { %2946 = vmatpush3.bf16.msra.mxu0 %v3175_v12  ;;  %2966 = vmatpush3.bf16.msra.mxu1 %v3178_v15  ;;  %v3561_v12 = vmov 2102212464  }
  0xbd   : > { %2947 = vmatprep.subr.bf16.mxu0 %v3177_v16  ;;  %2967 = vmatprep.subr.bf16.mxu1 %v3180_v17 }
  0xc0   : > { %2948 = vmatpush3.bf16.msra.mxu0 %v3177_v16  ;;  %2968 = vmatpush3.bf16.msra.mxu1 %v3180_v17 }
  0xc1   : > { %2949 = vmatprep.subr.bf16.mxu0 %v3179_v18  ;;  %2969 = vmatprep.subr.bf16.mxu1 %v3182_v19 }
  0xc4   : > { %2950 = vmatpush3.bf16.msra.mxu0 %v3179_v18  ;;  %2970 = vmatpush3.bf16.msra.mxu1 %v3182_v19 }
  0xc5   : > { %2951 = vmatprep.subr.bf16.mxu0 %v3181_v20  ;;  %2971 = vmatprep.subr.bf16.mxu1 %v3184_v21 }
  0xc8   : > { %2952 = vmatpush3.bf16.msra.mxu0 %v3181_v20  ;;  %2972 = vmatpush3.bf16.msra.mxu1 %v3184_v21  ;;  %v3563_v21 = vmov 1326507024  }
  0xc9   : > { %2953 = vmatprep.subr.bf16.mxu0 %v3183_v22  ;;  %2973 = vmatprep.subr.bf16.mxu1 %v3185_v25 }
  0xcc   : > { %2954 = vmatpush3.bf16.msra.mxu0 %v3183_v22  ;;  %2974 = vmatpush3.bf16.msra.mxu1 %v3185_v25 }
  0xcf   : > { %2956 = vmatmul.mubr.bf16.vlgmr.msra.gmra.mxu0 %v880_v26 }
 0x129   : > { %v1023_v29 = vpop.permute.xlu1 %1022  ;;  %v1013_v30 = vpop.permute.xlu0 %1012 }
 0x12a   : > { %v1038_v31 = vmul.f32 %v2795_v27, %v1023_v29  ;;  %v1036_v32 = vmul.f32 %v2795_v27, %v1013_v30 }
 0x12c   : > { %v3912_v33 = vadd.f32 %v2796_v28, %v1038_v31  ;;  %v3914_v34 = vadd.f32 %v2796_v28, %v1036_v32 }
 0x12d   : > { %v1028_v35 = vpop.permute.xlu1 %1027  ;;  %v1018_v36 = vpop.permute.xlu0 %1017 }
 0x12e   : > { %v1259_v37 = vand.u32 2147483647, %v3912_v33  ;;  %v1262_v38 = vand.u32 2139095040, %v3912_v33  ;;  %v1054_v39 = vand.u32 2139095040, %v3914_v34  ;;  %v1039_v40 = vmul.f32 %v2795_v27, %v1028_v35 }
 0x12f   : > { %v1037_v41 = vmul.f32 %v2795_v27, %v1018_v36  ;;  %v1051_v53 = vand.u32 2147483647, %v3914_v34 }
 0x130   : > { %v1263_v42 = vshrl.u32 %v1262_v38, 23  ;;  %v1055_v43 = vshrl.u32 %v1054_v39, 23  ;;  %v1266_v44 = vand.u32 8388607, %v1259_v37  ;;  %v3921_v45 = vadd.f32 %v2796_v28, %v1039_v40 }
 0x131   : > { %v3923_v46 = vadd.f32 %v2796_v28, %v1037_v41  ;;  %v3937_v2 = vand.u32 8388607, %v1051_v53 }
 0x132   : > { %v2805_v47 = vadd.s32 4294967169, %v1263_v42  ;;  %v2797_v48 = vadd.s32 4294967169, %v1055_v43  ;;  %v1363_v49 = vand.u32 2147483647, %v3921_v45  ;;  %v1366_v50 = vand.u32 2139095040, %v3921_v45 }
 0x133   : > { %v1267_v54 = vor.u32 8388608, %v1266_v44  ;;  %v1158_v57 = vand.u32 2139095040, %v3923_v46 }
 0x134   : > { %v1269_v51 = vadd.s32 1, %v2805_v47  ;;  %v1061_v52 = vadd.s32 1, %v2797_v48  ;;  %v1367_v55 = vshrl.u32 %v1366_v50, 23  ;;  %v1370_v56 = vand.u32 8388607, %v1363_v49 }
 0x135   : > { %v3933_v63 = vshll.u32 %v1267_v54, 8  ;;  %v1159_v1 = vshrl.u32 %v1158_v57, 23 }
 0x136   : > { %vm1270_vm0 = vcmp.gt.s32.totalorder %v1269_v51, 0  ;;  %vm1062_vm1 = vcmp.gt.s32.totalorder %v1061_v52, 0  ;;  %v2809_v60 = vadd.s32 4294967169, %v1367_v55  ;;  %v1371_v0 = vor.u32 8388608, %v1370_v56 }
 0x137   : > { %v1271_v58 = vsel %vm1270_vm0, %v1269_v51, 0  ;;  %v3931_v59 = vsel %vm1062_vm1, %v1061_v52, 0 }
 0x138   : > { %v1272_v61 = vshrl.u32 %v1271_v58, 5  ;;  %v1273_v62 = vand.u32 31, %v1271_v58  ;;  %v3941_v6 = vand.u32 31, %v3931_v59  ;;  %v1373_v7 = vadd.s32 1, %v2809_v60 }
 0x139   : > { %v3957_v42 = vshll.u32 %v1371_v0, 8  ;;  %v2801_v58 = vadd.s32 4294967169, %v1159_v1 }
 0x13a   : > { %v1274_v3 = vsub.s32 32, %v1273_v62  ;;  %v1276_v5 = vshll.u32 %v3558_v4, %v1273_v62  ;;  %v1279_v9 = vshll.u32 %v3559_v8, %v1273_v62  ;;  %v1282_v11 = vshll.u32 %v3560_v10, %v1273_v62 }
 0x13b   : > { %v1285_v13 = vshll.u32 %v3561_v12, %v1273_v62  ;;  %v1288_v15 = vshll.u32 %v3562_v14, %v1273_v62  ;;  %vm1291_vm2 = vcmp.lt.s32.totalorder %v1272_v61, 1  ;;  %vm1292_vm3 = vcmp.lt.s32.totalorder %v1272_v61, 2 }
 0x13c   : > { %v1277_v16 = vshrl.u32 %v3559_v8, %v1274_v3  ;;  %v1280_v17 = vshrl.u32 %v3560_v10, %v1274_v3  ;;  %v1283_v18 = vshrl.u32 %v3561_v12, %v1274_v3  ;;  %v1275_v19 = vshrl.u32 %v3558_v4, %v1274_v3 }
 0x13d   : > { %v1286_v20 = vshrl.u32 %v3562_v14, %v1274_v3  ;;  %v1289_v22 = vshrl.u32 %v3563_v21, %v1274_v3  ;;  %vm1293_vm4 = vcmp.lt.s32.totalorder %v1272_v61, 3  ;;  %vm1294_vm5 = vcmp.lt.s32.totalorder %v1272_v61, 4 }
 0x13e   : > { %v1278_v23 = vor.u32 %v1277_v16, %v1276_v5  ;;  %v1281_v24 = vor.u32 %v1280_v17, %v1279_v9  ;;  %v1284_v25 = vor.u32 %v1283_v18, %v1282_v11  ;;  %vm1374_vm6 = vcmp.gt.s32.totalorder %v1373_v7, 0 }
 0x13f   : > { %v1287_v26 = vor.u32 %v1286_v20, %v1285_v13  ;;  %v1290_v27 = vor.u32 %v1289_v22, %v1288_v15  ;;  %v1375_v38 = vsel %vm1374_vm6, %v1373_v7, 0 }
 0x140   : > { %v1295_v28 = vsel %vm1291_vm2, %v1275_v19, %v1278_v23  ;;  %v1296_v29 = vsel %vm1294_vm5, %v1284_v25, 2102212464  ;;  %v1299_v30 = vsel %vm1291_vm2, %v1278_v23, %v1281_v24  ;;  %v1303_v31 = vsel %vm1291_vm2, %v1281_v24, %v1284_v25 }
 0x141   : > { %v1297_v32 = vsel %vm1293_vm4, %v1281_v24, %v1296_v29  ;;  %v1300_v35 = vsel %vm1294_vm5, %v1287_v26, 920167782  ;;  %v1304_v36 = vsel %vm1294_vm5, %v1290_v27, 1326507024  ;;  %v1376_v47 = vshrl.u32 %v1375_v38, 5 }
 0x142   : > { %v1298_v39 = vsel %vm1292_vm3, %v1295_v28, %v1297_v32  ;;  %v1301_v40 = vsel %vm1293_vm4, %v1284_v25, %v1300_v35  ;;  %v1305_v41 = vsel %vm1293_vm4, %v1287_v26, %v1304_v36  ;;  %v1377_v48 = vand.u32 31, %v1375_v38 }
 0x143   : > { %v1302_v43 = vsel %vm1292_vm3, %v1299_v30, %v1301_v40  ;;  %v1306_v44 = vsel %vm1292_vm3, %v1303_v31, %v1305_v41  ;;  %v1314_v55 = vmul.u32 %v3933_v63, %v1298_v39  ;;  %vm1395_vm7 = vcmp.lt.s32.totalorder %v1376_v47, 1 }
 0x144   : > { %v3962_v50 = vmul.u32.u64.low %v3933_v63, %v1306_v44  ;;  %v3963_v51 = vmul.u32.u64.high %v3933_v63, %v1306_v44, %v3962_v50  ;;  %v3966_v52 = vmul.u32.u64.low %v3933_v63, %v1302_v43  ;;  %v3967_v54 = vmul.u32.u64.high %v3933_v63, %v1302_v43, %v3966_v52 }
 0x145   : > { %v1378_v56 = vsub.s32 32, %v1377_v48  ;;  %v1380_v57 = vshll.u32 %v3558_v4, %v1377_v48  ;;  %v1383_v60 = vshll.u32 %v3559_v8, %v1377_v48  ;;  %v1386_v61 = vshll.u32 %v3560_v10, %v1377_v48 }
 0x146   : > { %v1389_v62 = vshll.u32 %v3561_v12, %v1377_v48  ;;  %v1392_v0 = vshll.u32 %v3562_v14, %v1377_v48  ;;  %vm1316_vm8 = vc.u32 %v3963_v51, %v3966_v52  ;;  %v1317_v63 = vadd.s32 1, %v3967_v54 }
 0x147   : > { %v1381_v3 = vshrl.u32 %v3559_v8, %v1378_v56  ;;  %v1384_v5 = vshrl.u32 %v3560_v10, %v1378_v56  ;;  %v1387_v7 = vshrl.u32 %v3561_v12, %v1378_v56  ;;  %v1379_v1 = vshrl.u32 %v3558_v4, %v1378_v56 }
 0x148   : > { %v1390_v9 = vshrl.u32 %v3562_v14, %v1378_v56  ;;  %v1393_v16 = vshrl.u32 %v3563_v21, %v1378_v56  ;;  %v1318_v17 = vsel %vm1316_vm8, %v1317_v63, %v3967_v54  ;;  %vm1397_vm9 = vcmp.lt.s32.totalorder %v1376_v47, 3 }
 0x149   : > { %v1382_v11 = vor.u32 %v1381_v3, %v1380_v57  ;;  %v1385_v13 = vor.u32 %v1384_v5, %v1383_v60  ;;  %v1388_v15 = vor.u32 %v1387_v7, %v1386_v61  ;;  %vm1398_vm10 = vcmp.lt.s32.totalorder %v1376_v47, 4 }
 0x14a   : > { %v1391_v18 = vor.u32 %v1390_v9, %v1389_v62  ;;  %v1319_v19 = vadd.s32 %v1318_v17, %v1314_v55  ;;  %v1394_v20 = vor.u32 %v1393_v16, %v1392_v0  ;;  %vm1396_vm11 = vcmp.lt.s32.totalorder %v1376_v47, 2 }
 0x14b   : > { %v1399_v22 = vsel %vm1395_vm7, %v1379_v1, %v1382_v11  ;;  %v1400_v23 = vsel %vm1398_vm10, %v1388_v15, 2102212464  ;;  %v1403_v25 = vsel %vm1395_vm7, %v1382_v11, %v1385_v13  ;;  %v1407_v27 = vsel %vm1395_vm7, %v1385_v13, %v1388_v15 }
 0x14c   : > { %v1401_v24 = vsel %vm1397_vm9, %v1385_v13, %v1400_v23  ;;  %v1404_v26 = vsel %vm1398_vm10, %v1391_v18, 920167782  ;;  %v1320_v28 = vadd.s32 536870912, %v1319_v19  ;;  %v1408_v30 = vsel %vm1398_vm10, %v1394_v20, 1326507024 }
 0x14d   : > { %v1405_v29 = vsel %vm1397_vm9, %v1388_v15, %v1404_v26  ;;  %v1066_v31 = vsub.s32 32, %v3941_v6  ;;  %v1402_v32 = vsel %vm1396_vm11, %v1399_v22, %v1401_v24  ;;  %v1409_v36 = vsel %vm1397_vm9, %v1391_v18, %v1408_v30 }
 0x14e   : > { %v1406_v35 = vsel %vm1396_vm11, %v1403_v25, %v1405_v29  ;;  %v3993_v38 = vshrl.u32 %v1320_v28, 30  ;;  %v1410_v39 = vsel %vm1396_vm11, %v1407_v27, %v1409_v36  ;;  %v1165_v48 = vadd.s32 1, %v2801_v58 }
 0x14f   : > { %v3996_v40 = vmul.u32.u64.low %v3957_v42, %v1406_v35  ;;  %v3997_v41 = vmul.u32.u64.high %v3957_v42, %v1406_v35, %v3996_v40  ;;  %v4001_v43 = vmul.u32.u64.low %v3957_v42, %v1410_v39  ;;  %v4002_v44 = vmul.u32.u64.high %v3957_v42, %v1410_v39, %v4001_v43 }
 0x150   : > { %v1322_v50 = vshll.u32 %v3993_v38, 30  ;;  %v1064_v54 = vshrl.u32 %v3931_v59, 5  ;;  %v1418_v47 = vmul.u32 %v3957_v42, %v1402_v32  ;;  %v1059_v55 = vor.u32 8388608, %v3937_v2 }
 0x151   : > { %v1068_v56 = vshll.u32 %v3558_v4, %v3941_v6  ;;  %v1069_v57 = vshrl.u32 %v3559_v8, %v1066_v31  ;;  %v1071_v60 = vshll.u32 %v3559_v8, %v3941_v6  ;;  %v1072_v61 = vshrl.u32 %v3560_v10, %v1066_v31 }
 0x152   : > { %v4014_v62 = vsub.s32 %v1319_v19, %v1322_v50  ;;  %v1421_v58 = vadd.s32 1, %v3997_v41  ;;  %v1074_v59 = vshll.u32 %v3560_v10, %v3941_v6  ;;  %v1075_v42 = vshrl.u32 %v3561_v12, %v1066_v31 }
 0x153   : > { %vm1420_vm12 = vc.u32 %v4002_v44, %v3996_v40  ;;  %vm1166_vm13 = vcmp.gt.s32.totalorder %v1165_v48, 0  ;;  %v1070_v2 = vor.u32 %v1069_v57, %v1068_v56  ;;  %v1073_v0 = vor.u32 %v1072_v61, %v1071_v60 }
 0x154   : > { %v1325_v3 = vsub.s32 0, %v4014_v62  ;;  %v1422_v5 = vsel %vm1420_vm12, %v1421_v58, %v3997_v41  ;;  %v1076_v7 = vor.u32 %v1075_v42, %v1074_v59  ;;  %v1077_v63 = vshll.u32 %v3561_v12, %v3941_v6 }
 0x155   : > { %v1423_v1 = vadd.s32 %v1422_v5, %v1418_v47  ;;  %v1078_v9 = vshrl.u32 %v3562_v14, %v1066_v31  ;;  %v1080_v11 = vshll.u32 %v3562_v14, %v3941_v6  ;;  %v1081_v13 = vshrl.u32 %v3563_v21, %v1066_v31 }
 0x156   : > { %v1167_v15 = vsel %vm1166_vm13, %v1165_v48, 0  ;;  %vm1083_vm14 = vcmp.lt.s32.totalorder %v1064_v54, 1  ;;  %v1099_v16 = vshll.u32 %v1059_v55, 8  ;;  %vm1086_vm15 = vcmp.lt.s32.totalorder %v1064_v54, 4 }
 0x157   : > { %v1424_v17 = vadd.s32 536870912, %v1423_v1  ;;  %v1079_v18 = vor.u32 %v1078_v9, %v1077_v63  ;;  %v1082_v19 = vor.u32 %v1081_v13, %v1080_v11  ;;  %v2806_v20 = vmin.u32 %v1325_v3, %v4014_v62 }
 0x158   : > { %v1067_v22 = vshrl.u32 %v3558_v4, %v1066_v31  ;;  %v1088_v23 = vsel %vm1086_vm15, %v1076_v7, 2102212464  ;;  %v1091_v24 = vsel %vm1083_vm14, %v1070_v2, %v1073_v0  ;;  %vm1085_vm0 = vcmp.lt.s32.totalorder %v1064_v54, 3 }
 0x159   : > { %v4032_v25 = vshrl.u32 %v1424_v17, 30  ;;  %v1092_v26 = vsel %vm1086_vm15, %v1079_v18, 920167782  ;;  %v1095_v6 = vsel %vm1083_vm14, %v1073_v0, %v1076_v7  ;;  %vm1084_vm1 = vcmp.lt.s32.totalorder %v1064_v54, 2 }
 0x15a   : > { %v1087_v27 = vsel %vm1083_vm14, %v1067_v22, %v1070_v2  ;;  %v1093_v28 = vsel %vm1085_vm0, %v1076_v7, %v1092_v26  ;;  %v1096_v29 = vsel %vm1086_vm15, %v1082_v19, 1326507024  ;;  %v1089_v32 = vsel %vm1085_vm0, %v1073_v0, %v1088_v23 }
 0x15b   : > { %v1426_v30 = vshll.u32 %v4032_v25, 30  ;;  %v1094_v35 = vsel %vm1084_vm1, %v1091_v24, %v1093_v28  ;;  %v1097_v36 = vsel %vm1085_vm0, %v1079_v18, %v1096_v29  ;;  %v1169_v48 = vand.u32 31, %v1167_v15 }
 0x15c   : > { %v1098_v39 = vsel %vm1084_vm1, %v1095_v6, %v1097_v36  ;;  %v4035_v41 = vmul.u32.u64.low %v1099_v16, %v1094_v35  ;;  %v4036_v43 = vmul.u32.u64.high %v1099_v16, %v1094_v35, %v4035_v41  ;;  %v1090_v54 = vsel %vm1084_vm1, %v1087_v27, %v1089_v32 }
 0x15d   : > { %v4039_v31 = vsub.s32 %v1423_v1, %v1426_v30  ;;  %v4041_v50 = vmul.u32.u64.low %v1099_v16, %v1098_v39  ;;  %v4042_v47 = vmul.u32.u64.high %v1099_v16, %v1098_v39, %v4041_v50  ;;  %v1327_v55 = vclz %v2806_v20 }
 0x15e   : > { %v1109_v57 = vadd.s32 1, %v4036_v43  ;;  %v1170_v61 = vsub.s32 32, %v1169_v48  ;;  %v1106_v58 = vmul.u32 %v1099_v16, %v1090_v54  ;;  %v1155_v3 = vand.u32 2147483647, %v3923_v46 }
 0x15f   : > { %v1429_v56 = vsub.s32 0, %v4039_v31  ;;  %vm1108_vm2 = vc.u32 %v4042_v47, %v4035_v41  ;;  %v2807_v42 = vadd.s32 4294967294, %v1327_v55  ;;  %v1172_v13 = vshll.u32 %v3558_v4, %v1169_v48 }
 0x160   : > { %v1110_v59 = vsel %vm1108_vm2, %v1109_v57, %v4036_v43  ;;  %v1173_v7 = vshrl.u32 %v3559_v8, %v1170_v61  ;;  %v1176_v1 = vshrl.u32 %v3560_v10, %v1170_v61  ;;  %v1182_v9 = vshrl.u32 %v3562_v14, %v1170_v61 }
 0x161   : > { %v2810_v60 = vmin.u32 %v1429_v56, %v4039_v31  ;;  %v1111_v0 = vadd.s32 %v1110_v59, %v1106_v58  ;;  %vm2808_vm3 = vcmp.lt.s32.totalorder %v2807_v42, 0  ;;  %v1179_v16 = vshrl.u32 %v3561_v12, %v1170_v61 }
 0x162   : > { %v1162_v17 = vand.u32 8388607, %v1155_v3  ;;  %v1175_v18 = vshll.u32 %v3559_v8, %v1169_v48  ;;  %v1181_v19 = vshll.u32 %v3561_v12, %v1169_v48  ;;  %v1185_v20 = vshrl.u32 %v3563_v21, %v1170_v61 }
 0x163   : > { %v1431_v2 = vclz %v2810_v60  ;;  %v1112_v5 = vadd.s32 536870912, %v1111_v0  ;;  %v1168_v22 = vshrl.u32 %v1167_v15, 5  ;;  %v1174_v24 = vor.u32 %v1173_v7, %v1172_v13 }
 0x164   : > { %v1178_v26 = vshll.u32 %v3560_v10, %v1169_v48  ;;  %v1177_v6 = vor.u32 %v1176_v1, %v1175_v18  ;;  %v1183_v27 = vor.u32 %v1182_v9, %v1181_v19  ;;  %v1184_v28 = vshll.u32 %v3562_v14, %v1169_v48 }
 0x165   : > { %v2811_v63 = vadd.s32 4294967294, %v1431_v2  ;;  %v4054_v11 = vshrl.u32 %v1112_v5, 30  ;;  %v1330_v29 = vsel %vm2808_vm3, 0, %v2807_v42  ;;  %v1163_v32 = vor.u32 8388608, %v1162_v17 }
 0x166   : > { %v1180_v8 = vor.u32 %v1179_v16, %v1178_v26  ;;  %v1186_v12 = vor.u32 %v1185_v20, %v1184_v28  ;;  %vm1187_vm5 = vcmp.lt.s32.totalorder %v1168_v22, 1  ;;  %vm1190_vm6 = vcmp.lt.s32.totalorder %v1168_v22, 4 }
 0x167   : > { %v1114_v23 = vshll.u32 %v4054_v11, 30  ;;  %vm2812_vm4 = vcmp.lt.s32.totalorder %v2811_v63, 0  ;;  %v1335_v15 = vsub.s32 4294967266, %v1330_v29  ;;  %v1171_v10 = vshrl.u32 %v3558_v4, %v1170_v61 }
 0x168   : > { %v1434_v35 = vsel %vm2812_vm4, 0, %v2811_v63  ;;  %v1195_v36 = vsel %vm1187_vm5, %v1174_v24, %v1177_v6  ;;  %v1196_v39 = vsel %vm1190_vm6, %v1183_v27, 920167782  ;;  %vm1188_vm7 = vcmp.lt.s32.totalorder %v1168_v22, 2 }
 0x169   : > { %v4067_v30 = vsub.s32 %v1111_v0, %v1114_v23  ;;  %vm1189_vm8 = vcmp.lt.s32.totalorder %v1168_v22, 3  ;;  %v1199_v43 = vsel %vm1187_vm5, %v1177_v6, %v1180_v8  ;;  %v1439_v48 = vsub.s32 4294967266, %v1434_v35 }
 0x16a   : > { %v1192_v50 = vsel %vm1190_vm6, %v1180_v8, 2102212464  ;;  %v1197_v54 = vsel %vm1189_vm8, %v1180_v8, %v1196_v39  ;;  %v1200_v55 = vsel %vm1190_vm6, %v1186_v12, 1326507024  ;;  %v1203_v58 = vshll.u32 %v1163_v32, 8 }
 0x16b   : > { %v1117_v21 = vsub.s32 0, %v4067_v30  ;;  %v1198_v57 = vsel %vm1188_vm7, %v1195_v36, %v1197_v54  ;;  %v1201_v60 = vsel %vm1189_vm8, %v1183_v27, %v1200_v55  ;;  %v1191_v4 = vsel %vm1187_vm5, %v1171_v10, %v1174_v24 }
 0x16c   : > { %v1202_v61 = vsel %vm1188_vm7, %v1199_v43, %v1201_v60  ;;  %v1193_v42 = vsel %vm1189_vm8, %v1177_v6, %v1192_v50  ;;  %v1336_v5 = vadd.s32 127, %v1335_v15  ;;  %v1440_v1 = vadd.s32 127, %v1439_v48 }
 0x16d   : > { %v2798_v14 = vmin.u32 %v1117_v21, %v4067_v30  ;;  %v4077_v2 = vmul.u32.u64.low %v1203_v58, %v1202_v61  ;;  %v4078_v0 = vmul.u32.u64.high %v1203_v58, %v1202_v61, %v4077_v2  ;;  %v1194_v13 = vsel %vm1188_vm7, %v1191_v4, %v1193_v42 }
 0x16e   : > { %v4080_v7 = vmul.u32.u64.low %v1203_v58, %v1198_v57  ;;  %v4081_v63 = vmul.u32.u64.high %v1203_v58, %v1198_v57, %v4080_v7  ;;  %v1331_v16 = vsub.s32 32, %v1330_v29  ;;  %v1435_v17 = vsub.s32 32, %v1434_v35 }
 0x16f   : > { %v1119_v56 = vclz %v2798_v14  ;;  %v1315_v19 = vadd.s32 %v3966_v52, %v3963_v51  ;;  %v1337_v20 = vshll.u32 %v1336_v5, 23  ;;  %v1419_v24 = vadd.s32 %v3996_v40, %v4002_v44 }
 0x170   : > { %vm1212_vm10 = vc.u32 %v4078_v0, %v4080_v7  ;;  %v1213_v23 = vadd.s32 1, %v4081_v63  ;;  %v1441_v26 = vshll.u32 %v1440_v1, 23  ;;  %v1210_v27 = vmul.u32 %v1203_v58, %v1194_v13 }
 0x171   : > { %v2799_v59 = vadd.s32 4294967294, %v1119_v56  ;;  %v1333_v28 = vshrl.u32 %v1315_v19, %v1331_v16  ;;  %v1437_v8 = vshrl.u32 %v1419_v24, %v1435_v17  ;;  %v1332_v21 = vshll.u32 %v4014_v62, %v1330_v29 }
 0x172   : > { %v1214_v22 = vsel %vm1212_vm10, %v1213_v23, %v4081_v63  ;;  %v1338_v51 = vor.u32 4788187, %v1337_v20  ;;  %v1107_v52 = vadd.s32 %v4035_v41, %v4042_v47  ;;  %v1436_v15 = vshll.u32 %v4039_v31, %v1434_v35 }
 0x173   : > { %vm2800_vm9 = vcmp.lt.s32.totalorder %v2799_v59, 0  ;;  %v1215_v12 = vadd.s32 %v1214_v22, %v1210_v27  ;;  %v1442_v10 = vor.u32 4788187, %v1441_v26  ;;  %v1334_v44 = vor.u32 %v1333_v28, %v1332_v21 }
 0x174   : > { %v1122_v9 = vsel %vm2800_vm9, 0, %v2799_v59  ;;  %v1438_v39 = vor.u32 %v1437_v8, %v1436_v15  ;;  %v1339_v48 = vand.u32 2147483647, %v1338_v51  ;;  %vm1261_vm11 = vcmp.lt.s32.totalorder %v3912_v33, 0 }
 0x175   : > { %v1127_v18 = vsub.s32 4294967266, %v1122_v9  ;;  %v1123_v32 = vsub.s32 32, %v1122_v9  ;;  %v1216_v40 = vadd.s32 536870912, %v1215_v12  ;;  %v1443_v50 = vand.u32 2147483647, %v1442_v10 }
 0x176   : > { %v1124_v54 = vshll.u32 %v4067_v30, %v1122_v9  ;;  %v1341_v29 = vcvt.s32.f32 %v1334_v44  ;;  %v1445_v56 = vcvt.s32.f32 %v1438_v39  ;;  %vm1365_vm12 = vcmp.lt.s32.totalorder %v3921_v45, 0 }
 0x177   : > { %v1128_v6 = vadd.s32 127, %v1127_v18  ;;  %v1125_v14 = vshrl.u32 %v1107_v52, %v1123_v32  ;;  %v4095_v43 = vshrl.u32 %v1216_v40, 30  ;;  %vm4107_vm14 = vcmp.le.f32.partialorder %v1259_v37, 0.7853982 }
 0x178   : > { %v1342_v31 = vmul.f32 %v1341_v29, %v1339_v48  ;;  %v1446_v35 = vmul.f32 %v1445_v56, %v1443_v50  ;;  %v1211_v16 = vadd.s32 %v4080_v7, %v4078_v0  ;;  %vm4114_vm15 = vcmp.le.f32.partialorder %v1363_v49, 0.7853982 }
 0x179   : > { %v1129_v36 = vshll.u32 %v1128_v6, 23  ;;  %v1218_v62 = vshll.u32 %v4095_v43, 30  ;;  %v1126_v41 = vor.u32 %v1125_v14, %v1124_v54  ;;  %vm1053_vm0 = vcmp.lt.s32.totalorder %v3914_v34, 0 }
 0x17a   : > { %v1343_v61 = vxor.u32 2147483648, %v1342_v31  ;;  %v1447_v59 = vxor.u32 2147483648, %v1446_v35  ;;  %vm4129_vm1 = vcmp.le.f32.partialorder %v1051_v53, 0.7853982  ;;  %v1449_v28 = vsub.s32 4, %v4032_v25 }
 0x17b   : > { %v1130_v55 = vor.u32 4788187, %v1129_v36  ;;  %v1219_v47 = vsub.s32 %v1215_v12, %v1218_v62  ;;  %v1133_v58 = vcvt.s32.f32 %v1126_v41  ;;  %v1137_v53 = vsub.s32 4, %v4054_v11 }
 0x17c   : > { %v1344_v30 = vsel %vm1261_vm11, %v1343_v61, %v1342_v31  ;;  %v1448_v63 = vsel %vm1365_vm12, %v1447_v59, %v1446_v35  ;;  %v1345_v12 = vsub.s32 4, %v3993_v38  ;;  %v1450_v51 = vsel %vm1365_vm12, %v1449_v28, %v4032_v25 }
 0x17d   : > { %v1131_v57 = vand.u32 2147483647, %v1130_v55  ;;  %v1221_v60 = vsub.s32 0, %v1219_v47  ;;  %v1347_v20 = vsel %vm4107_vm14, %v3912_v33, %v1344_v30  ;;  %v1451_v37 = vsel %vm4114_vm15, %v3921_v45, %v1448_v63 }
 0x17e   : > { %3186 = vcosq.f32 %v1347_v20  ;;  %v1138_v15 = vsel %vm1053_vm0, %v1137_v53, %v4054_v11  ;;  %vm1157_vm2 = vcmp.lt.s32.totalorder %v3923_v46, 0  ;;  %v1241_v10 = vsub.s32 4, %v4095_v43 }
 0x17f   : > { %v2802_v4 = vmin.u32 %v1221_v60, %v1219_v47  ;;  %v1134_v42 = vmul.f32 %v1133_v58, %v1131_v57  ;;  %3188 = vcosq.f32 %v1451_v37  ;;  %v1346_v36 = vsel %vm1261_vm11, %v1345_v12, %v3993_v38 }
 0x180   : > { %3190 = vsinq.f32 %v1451_v37  ;;  %vm4152_vm3 = vcmp.le.f32.partialorder %v1155_v3, 0.7853982  ;;  %v1452_v44 = vsel %vm4114_vm15, 0, %v1450_v51  ;;  %v1140_v39 = vsel %vm4129_vm1, 0, %v1138_v15  ;;  %v2813_v51 = vld [vmem:[#allocation11] ss:$0 sm:$0xff] }
 0x181   : > { %v1223_v2 = vclz %v2802_v4  ;;  %v1135_v1 = vxor.u32 2147483648, %v1134_v42  ;;  %3192 = vsinq.f32 %v1347_v20  ;;  %v1348_v38 = vsel %vm4107_vm14, 0, %v1346_v36 }
 0x182   : > { %v1242_v3 = vsel %vm1157_vm2, %v1241_v10, %v4095_v43  ;;  %v1456_v48 = vadd.s32 3, %v1452_v44  ;;  %v1144_v55 = vadd.s32 3, %v1140_v39  ;;  %v1352_v62 = vadd.s32 3, %v1348_v38 }
 0x183   : > { %v2803_v5 = vadd.s32 4294967294, %v1223_v2  ;;  %v1136_v0 = vsel %vm1053_vm0, %v1135_v1, %v1134_v42  ;;  %v1244_v56 = vsel %vm4152_vm3, 0, %v1242_v3  ;;  %vm1455_vm14 = vweird.f32 %v3921_v45  ;;  %v2786_v45 = vld [vmem:[%s4574_s27] ss:$0 sm:$0xff] }
 0x184   : > { %v1139_v27 = vsel %vm4129_vm1, %v3914_v34, %v1136_v0  ;;  %v1145_v60 = vand.u32 3, %v1144_v55  ;;  %v1248_v58 = vadd.s32 3, %v1244_v56  ;;  %v1353_v4 = vand.u32 3, %v1352_v62 }
 0x185   : > { %vm2804_vm13 = vcmp.lt.s32.totalorder %v2803_v5, 0  ;;  %3194 = vcosq.f32 %v1139_v27  ;;  %vm1351_vm1 = vweird.f32 %v3912_v33 }
 0x186   : > { %v1226_v9 = vsel %vm2804_vm13, 0, %v2803_v5  ;;  %3196 = vsinq.f32 %v1139_v27  ;;  %vm1147_vm6 = vcmp.eq.s32.totalorder %v1145_v60, 0  ;;  %v1249_v30 = vand.u32 3, %v1248_v58 }
 0x187   : > { %v1227_v17 = vsub.s32 32, %v1226_v9  ;;  %v1231_v18 = vsub.s32 4294967266, %v1226_v9  ;;  %v1228_v7 = vshll.u32 %v1219_v47, %v1226_v9  ;;  %v1457_v47 = vand.u32 3, %v1456_v48 }
 0x188   : > { %vm1355_vm7 = vcmp.eq.s32.totalorder %v1353_v4, 0  ;;  %vm1358_vm8 = vcmp.eq.s32.totalorder %v1353_v4, 2  ;;  %vm1150_vm9 = vcmp.eq.s32.totalorder %v1145_v60, 2  ;;  %vm1146_vm11 = vcmp.lt.s32.totalorder %v1145_v60, 2 }
 0x189   : > { %v1229_v23 = vshrl.u32 %v1211_v16, %v1227_v17  ;;  %v1232_v24 = vadd.s32 127, %v1231_v18  ;;  %vm1459_vm4 = vcmp.eq.s32.totalorder %v1457_v47, 0  ;;  %vm1462_vm5 = vcmp.eq.s32.totalorder %v1457_v47, 2 }
 0x18a   : > { %vm1458_vm10 = vcmp.lt.s32.totalorder %v1457_v47, 2  ;;  %vm1354_vm12 = vcmp.lt.s32.totalorder %v1353_v4, 2  ;;  %vm1254_vm13 = vcmp.eq.s32.totalorder %v1249_v30, 2  ;;  %vm1251_vm15 = vcmp.eq.s32.totalorder %v1249_v30, 0 }
 0x18b   : > { %v1230_v26 = vor.u32 %v1229_v23, %v1228_v7  ;;  %v1233_v6 = vshll.u32 %v1232_v24, 23  ;;  %v3187_v14 = vpop.eup %3186  ;;  %vm1250_vm0 = vcmp.lt.s32.totalorder %v1249_v30, 2 }
 0x18c   : > { %v3189_v50 = vpop.eup %3188  ;;  %v1359_v43 = vxor.u32 2147483648, %v3187_v14 }
 0x18d   : > { %v1234_v22 = vor.u32 4788187, %v1233_v6  ;;  %v1237_v32 = vcvt.s32.f32 %v1230_v26  ;;  %v3191_v54 = vpop.eup %3190  ;;  %v1463_v57 = vxor.u32 2147483648, %v3189_v50 }
 0x18e   : > { %v3193_v29 = vpop.eup %3192  ;;  %v1460_v35 = vxor.u32 2147483648, %v3191_v54 }
 0x18f   : > { %v1235_v8 = vand.u32 2147483647, %v1234_v22  ;;  %v1356_v61 = vxor.u32 2147483648, %v3193_v29  ;;  %v1464_v5 = vsel %vm1462_vm5, %v1463_v57, %v3191_v54  ;;  %v1360_v1 = vsel %vm1358_vm8, %v1359_v43, %v3193_v29 }
 0x190   : > { %v1461_v2 = vsel %vm1459_vm4, %v3189_v50, %v1460_v35 }
 0x191   : > { %v1238_v21 = vmul.f32 %v1237_v32, %v1235_v8  ;;  %v1357_v63 = vsel %vm1355_vm7, %v3187_v14, %v1356_v61  ;;  %v1465_v17 = vsel %vm1458_vm10, %v1461_v2, %v1464_v5  ;;  %v2957_v8 = vpop.f32.mrf.mxu0 }
 0x192   : > { %v3195_v41 = vpop.eup %3194  ;;  %v1361_v37 = vsel %vm1354_vm12, %v1357_v63, %v1360_v1  ;;  %v1466_v23 = vsel %vm1455_vm14, nan, %v1465_v17  ;;  %v995_v32 = vadd.f32 %v2957_v8, %v2786_v45 }
 0x193   : > { %v1239_v52 = vxor.u32 2147483648, %v1238_v21  ;;  %v3197_v31 = vpop.eup %3196  ;;  %v1151_v42 = vxor.u32 2147483648, %v3195_v41  ;;  %v1362_v26 = vsel %vm1351_vm1, nan, %v1361_v37  ;;  %v986_v53 = vpop.f32.mrf.mxu0 }
 0x194   : > { %v1148_v59 = vxor.u32 2147483648, %v3197_v31  ;;  %v1468_v22 = vpack.c.bf16 %v1466_v23, %v1362_v26  ;;  %1003 = vst [vmem:[#allocation15 + $0x10] sm:$0xff] %v995_v32  ;;  %v987_v33 = vadd.f32 %v2786_v45, %v986_v53 }
 0x195   : > { %v1240_v25 = vsel %vm1157_vm2, %v1239_v52, %v1238_v21  ;;  %v1152_v16 = vsel %vm1150_vm9, %v1151_v42, %v3197_v31  ;;  %vm1143_vm2 = vweird.f32 %v3914_v34  ;;  %v2958_v34 = vpop.f32.mrf.mxu0 }
 0x196   : > { %v1243_v11 = vsel %vm4152_vm3, %v3923_v46, %v1240_v25  ;;  %v1149_v13 = vsel %vm1147_vm6, %v3195_v41, %v1148_v59  ;;  %vm1247_vm3 = vweird.f32 %v3923_v46  ;;  %1001 = vst [vmem:[#allocation15] sm:$0xff] %v987_v33  ;;  %v998_v46 = vadd.f32 %v2958_v34, %v2786_v45 }
 0x197   : > { %3198 = vcosq.f32 %v1243_v11  ;;  %v1153_v0 = vsel %vm1146_vm11, %v1149_v13, %v1152_v16  ;;  %v989_v12 = vpop.f32.mrf.mxu0 }
 0x198   : > { %3200 = vsinq.f32 %v1243_v11  ;;  %v1154_v6 = vsel %vm1143_vm2, nan, %v1153_v0  ;;  %1004 = vst [vmem:[#allocation15 + $0x18] sm:$0xff] %v998_v46  ;;  %v990_v21 = vadd.f32 %v2786_v45, %v989_v12 }
 0x19a   : > { %1002 = vst [vmem:[#allocation15 + $0x8] sm:$0xff] %v990_v21 }
 0x1a4   : > { %v3199_v9 = vpop.eup %3198 }
 0x1a5   : > { %v3201_v18 = vpop.eup %3200  ;;  %v1255_v19 = vxor.u32 2147483648, %v3199_v9 }
 0x1a6   : > { %v1252_v20 = vxor.u32 2147483648, %v3201_v18 }
 0x1a7   : > { %v1256_v7 = vsel %vm1254_vm13, %v1255_v19, %v3201_v18 }
 0x1a8   : > { %v1253_v24 = vsel %vm1251_vm15, %v3199_v9, %v1252_v20 }
 0x1a9   : > { %v1257_v49 = vsel %vm1250_vm0, %v1253_v24, %v1256_v7 }
 0x1aa   : > { %v1258_v27 = vsel %vm1247_vm3, nan, %v1257_v49 }
 0x1ab   : > { %v1467_v28 = vpack.c.bf16 %v1258_v27, %v1154_v6 }
 0x1ad   : > { %2975 = vmatprep.mubr.bf16.mxu1 %v1467_v28 }
 0x1ae   : > { %2976 = vmatmul.mubr.bf16.vlgmr.msra.gmra.mxu1 %v1468_v22 }
 0x26e   : > { %v2977_v52 = vpop.f32.mrf.mxu1 }
 0x26f   : > { %v1583_v15 = vadd.f32 %v2977_v52, %v2813_v51 }
 0x270   : > { %v1574_v10 = vpop.f32.mrf.mxu1 }
 0x271   : > { %1591 = vst [vmem:[#allocation2 + $0x18] sm:$0xff] %v1583_v15  ;;  %v1575_v36 = vadd.f32 %v2813_v51, %v1574_v10 }
 0x272   : > { %v2978_v40 = vpop.f32.mrf.mxu1 }
 0x273   : > { %1589 = vst [vmem:[#allocation2 + $0x10] sm:$0xff] %v1575_v36  ;;  %v1586_v25 = vadd.f32 %v2978_v40, %v2813_v51 }
 0x274   : > { %v1577_v44 = vpop.f32.mrf.mxu1 }
 0x275   : > { %1592 = vst [vmem:[#allocation2 + $0x8] sm:$0xff] %v1586_v25  ;;  %v1578_v11 = vadd.f32 %v2813_v51, %v1577_v44 }
 0x277   : > { %1590 = vst [vmem:[#allocation2] sm:$0xff] %v1578_v11 }
 0x278 PF: > { %s4575_s14 = sld [smem:[#allocation27_spill]]  ;;  %v3564_v14 = vmov 0   ;;  %v3204_v30 = vld [vmem:[%s3875_s0 + $0x74] ss:$8 sps:$4 sm:$0xff]   ;;  %v3206_v63 = vld [vmem:[%s3875_s0 + $0x70] ss:$8 sps:$4 sm:$0xff]   ;;  %s4576_s3 = scalar_lea.vmem %s4489_s11, %s3858_s29 }
 0x279   : > { %3203 = vset.pattern.permute.xlu1 %v3564_v14  ;;  %3202 = vset.pattern.permute.xlu0 %v3564_v14  ;;  %v3207_v1 = vld [vmem:[%s3875_s0 + $0x64] ss:$8 sps:$4 sm:$0xff]   ;;  %v3209_v9 = vld [vmem:[%s3875_s0 + $0x60] ss:$8 sps:$4 sm:$0xff]   ;;  %v3210_v13 = vld [vmem:[%s3875_s0 + $0x54] ss:$8 sps:$4 sm:$0xff]  }
 0x27a   : > { %2191 = vmatprep.mubr.bf16.mxu0 %v3564_v14  ;;  %2159 = vmatprep.subr.bf16.mxu0 %v3204_v30  ;;  %v3212_v16 = vld [vmem:[%s3875_s0 + $0x50] ss:$8 sps:$4 sm:$0xff]   ;;  %v3213_v17 = vld [vmem:[%s3875_s0 + $0x44] ss:$8 sps:$4 sm:$0xff]   ;;  %v3215_v18 = vld [vmem:[%s3875_s0 + $0x40] ss:$8 sps:$4 sm:$0xff]  }
 0x27b   : > { %2160 = vmatpush1.bf16.msra.mxu0 %v3206_v63  ;;  %v3216_v19 = vld [vmem:[%s3875_s0 + $0x34] ss:$8 sps:$4 sm:$0xff]   ;;  %v3218_v20 = vld [vmem:[%s3875_s0 + $0x30] ss:$8 sps:$4 sm:$0xff]   ;;  %v3219_v37 = vld [vmem:[%s3875_s0 + $0x24] ss:$8 sps:$4 sm:$0xff]  }
 0x27c   : > { %2161 = vmatprep.subr.bf16.mxu0 %v3207_v1  ;;  %v3221_v0 = vld [vmem:[%s3875_s0 + $0x20] ss:$8 sps:$4 sm:$0xff]   ;;  %v3222_v7 = vld [vmem:[%s3875_s0 + $0x14] ss:$8 sps:$4 sm:$0xff]   ;;  %v3224_v23 = vld [vmem:[%s3875_s0 + $0x10] ss:$8 sps:$4 sm:$0xff]  }
 0x27d   : > { %v3225_v24 = vld [vmem:[%s3875_s0 + $0x4] ss:$8 sps:$4 sm:$0xff]   ;;  %v3227_v49 = vld [vmem:[%s3875_s0] ss:$8 sps:$4 sm:$0xff]   ;;  %v1597_v26 = vld [vmem:[#allocation2 + $0x10] sm:$0xff]  ;;  %vm1628_vm4 = vcmask 1042432  }
 0x27e   : > { %v1643_v39 = vld [vmem:[%s4575_s14 + $0x10] sm:$0xff]  ;;  %v1641_v38 = vld [vmem:[%s4575_s14] sm:$0xff]  ;;  %v1644_v3 = vld [vmem:[%s4575_s14 + $0x18] sm:$0xff]  ;;  %vm1684_vm5 = vcmask 1041408   ;;  %vm1742_vm6 = vcmask 1040384   ;;  %vm1800_vm7 = vcmask 1046528  }
 0x27f   : > { %1657 = vperm.xlu1 %3203, %v1643_v39   ;;  %1647 = vperm.xlu0 %3202, %v1641_v38   ;;  %v1642_v48 = vld [vmem:[%s4575_s14 + $0x8] sm:$0xff]  ;;  %v2826_v54 = vld [vmem:[%s4575_s14 + $0x20] sm:$0xff]  ;;  %v2829_v55 = vld [vmem:[%s4575_s14 + $0x38] sm:$0xff]  ;;  %vm1858_vm8 = vcmask 1045504   ;;  %vm1916_vm9 = vcmask 1044480   ;;  %s4577_s19 = sld [smem:[#allocation28_spill]] }
 0x280   : > { %v2827_v50 = vld [vmem:[%s4575_s14 + $0x28] sm:$0xff]  ;;  %v2828_v62 = vld [vmem:[%s4575_s14 + $0x30] sm:$0xff]  ;;  %v2832_v56 = vld [vmem:[%s4575_s14 + $0x40] sm:$0xff]  ;;  %2162 = vmatpush1.bf16.msra.mxu0 %v3209_v9  ;;  %p3098_p3 = scmp.eq.s32.totalorder %s3699_s24, 1 }
 0x281   : > { %v2833_v29 = vld [vmem:[%s4575_s14 + $0x48] sm:$0xff]  ;;  %v2835_v41 = vld [vmem:[%s4575_s14 + $0x58] sm:$0xff]  ;;  %v2834_v47 = vld [vmem:[%s4575_s14 + $0x50] sm:$0xff]  ;;  %2163 = vmatprep.subr.bf16.mxu0 %v3210_v13 }
 0x282   : > { %v2839_v31 = vld [vmem:[%s4575_s14 + $0x88] sm:$0xff]  ;;  %v2838_v35 = vld [vmem:[%s4575_s14 + $0x80] sm:$0xff]  ;;  %v2841_v57 = vld [vmem:[%s4575_s14 + $0x98] sm:$0xff] }
 0x283   : > { %1662 = vperm.xlu1 %3203, %v1644_v3   ;;  %1652 = vperm.xlu0 %3202, %v1642_v48   ;;  %v2840_v60 = vld [vmem:[%s4575_s14 + $0x90] sm:$0xff]  ;;  %v2845_v58 = vld [vmem:[%s4575_s14 + $0xa8] sm:$0xff]  ;;  %v2844_v4 = vld [vmem:[%s4575_s14 + $0xa0] sm:$0xff] }
 0x284   : > { %v2847_v61 = vld [vmem:[%s4575_s14 + $0xb8] sm:$0xff]  ;;  %v2846_v43 = vld [vmem:[%s4575_s14 + $0xb0] sm:$0xff]  ;;  %v2851_v59 = vld [vmem:[%s4575_s14 + $0xc8] sm:$0xff]  ;;  %2164 = vmatpush1.bf16.msra.mxu0 %v3212_v16 }
 0x285   : > { %v2850_v42 = vld [vmem:[%s4575_s14 + $0xc0] sm:$0xff]  ;;  %v2853_v2 = vld [vmem:[%s4575_s14 + $0xd8] sm:$0xff]  ;;  %v2852_v5 = vld [vmem:[%s4575_s14 + $0xd0] sm:$0xff]  ;;  %2165 = vmatprep.subr.bf16.mxu0 %v3213_v17 }
 0x286   : > { %v1598_v6 = vld [vmem:[#allocation2] sm:$0xff]  ;;  %v1599_v22 = vld [vmem:[#allocation2 + $0x18] sm:$0xff]  ;;  %v1600_v28 = vld [vmem:[#allocation2 + $0x8] sm:$0xff] }
 0x287   : > { %1709 = vperm.xlu1 %3203, %v2827_v50   ;;  %1704 = vperm.xlu0 %3202, %v2826_v54   ;;  %v2049_v27 = vpack.c.bf16 %v1598_v6, %v1597_v26  ;;  %v2050_v45 = vpack.c.bf16 %v1600_v28, %v1599_v22  ;;  %v4279_v12 = vld [vmem:[#allocation15 + $0x8] sm:$0xff]  ;;  %v4281_v21 = vld [vmem:[#allocation15 + $0x10] sm:$0xff]  ;;  %v2823_v51 = vld [vmem:[%s3870_s16 + $0x3] ss:$0 sm:$0xff] }
 0x288   : > { %2166 = vmatpush1.bf16.msra.mxu0 %v3215_v18  ;;  %v1630_v10 = vrot.slane %v4279_v12, 5  ;;  %v1632_v36 = vrot.slane %v4281_v21, 5  ;;  %v4290_v40 = vld [vmem:[#allocation15] sm:$0xff]  ;;  %v1611_v25 = vmul.f32 %v2823_v51, %v4281_v21  ;;  %v4294_v11 = vld [vmem:[#allocation15 + $0x18] sm:$0xff]  ;;  %v1610_v39 = vmul.f32 %v2823_v51, %v4279_v12 }
 0x289   : > { %2167 = vmatprep.subr.bf16.mxu0 %v3216_v19  ;;  %v1609_v44 = vmul.f32 %v2823_v51, %v4290_v40  ;;  %v2824_v38 = vld [vmem:[%s4576_s3] ss:$0 sm:$0xff]  ;;  %v1612_v3 = vmul.f32 %v2823_v51, %v4294_v11  ;;  %v1686_v48 = vrot.slane %v4279_v12, 6  ;;  %v1802_v63 = vrot.slane %v4279_v12, 1 }
 0x28a   : > { %v1804_v1 = vrot.slane %v4281_v21, 1  ;;  %v1801_v16 = vrot.slane %v4290_v40, 1  ;;  %v1859_v6 = vrot.slane %v4290_v40, 2  ;;  %v1920_v51 = vrot.slane %v4281_v21, 3 }
 0x28b   : > { %1719 = vperm.xlu1 %3203, %v2829_v55   ;;  %1714 = vperm.xlu0 %3202, %v2828_v62   ;;  %v1633_v55 = vsel %vm1628_vm4, %v1630_v10, %v1632_v36  ;;  %v1634_v62 = vrot.slane %v4294_v11, 5 }
 0x28c   : > { %2168 = vmatpush1.bf16.msra.mxu0 %v3218_v20  ;;  %v1805_v26 = vsel %vm1800_vm7, %v1802_v63, %v1804_v1  ;;  %v1803_v28 = vsel %vm1800_vm7, %v1801_v16, %v1802_v63 }
 0x28d   : > { %2169 = vmatprep.subr.bf16.mxu0 %v3219_v37 }
 0x28f   : > { %1767 = vperm.xlu1 %3203, %v2833_v29   ;;  %1762 = vperm.xlu0 %3202, %v2832_v56   ;;  %v1685_v29 = vrot.slane %v4290_v40, 6  ;;  %v1688_v56 = vrot.slane %v4281_v21, 6 }
 0x290   : > { %2170 = vmatpush1.bf16.msra.mxu0 %v3221_v0 }
 0x291   : > { %2171 = vmatprep.subr.bf16.mxu0 %v3222_v7  ;;  %v1687_v30 = vsel %vm1684_vm5, %v1685_v29, %v1686_v48  ;;  %v1696_v9 = vsel %vm1684_vm5, 0.0, %v1685_v29  ;;  %v1689_v13 = vsel %vm1684_vm5, %v1686_v48, %v1688_v56 }
 0x293   : > { %1777 = vperm.xlu1 %3203, %v2835_v41   ;;  %1772 = vperm.xlu0 %3202, %v2834_v47   ;;  %v4313_v41 = vadd.f32 %v2824_v38, %v1611_v25  ;;  %v4315_v47 = vadd.f32 %v2824_v38, %v1609_v44  ;;  %v1922_v25 = vrot.slane %v4294_v11, 3  ;;  %v2825_v44 = vld [vmem:[%s3870_s16] ss:$0 sm:$0xff] }
 0x294   : > { %2172 = vmatpush1.bf16.msra.mxu0 %v3224_v23  ;;  %v1806_v23 = vrot.slane %v4294_v11, 1 }
 0x295   : > { %2173 = vmatprep.subr.bf16.mxu0 %v3225_v24  ;;  %v1860_v24 = vrot.slane %v4279_v12, 2 }
 0x297   : > { %1825 = vperm.xlu1 %3203, %v2839_v31   ;;  %1820 = vperm.xlu0 %3202, %v2838_v35   ;;  %v4317_v31 = vadd.f32 %v2824_v38, %v1610_v39  ;;  %v1690_v35 = vrot.slane %v4294_v11, 6 }
 0x298   : > { %2174 = vmatpush1.bf16.msra.mxu0 %v3227_v49  ;;  %v1862_v49 = vrot.slane %v4281_v21, 2 }
 0x299   : > { %v1691_v17 = vsel %vm1684_vm5, %v1688_v56, %v1690_v35  ;;  %v1861_v56 = vsel %vm1858_vm8, %v1859_v6, %v1860_v24 }
 0x29a   : > { %v1863_v48 = vsel %vm1858_vm8, %v1860_v24, %v1862_v49  ;;  %v2843_v24 = vld [vmem:[%s3870_s16 + $0x4] ss:$0 sm:$0xff] }
 0x29b   : > { %1835 = vperm.xlu1 %3203, %v2841_v57   ;;  %1830 = vperm.xlu0 %3202, %v2840_v60   ;;  %v1743_v57 = vrot.slane %v4290_v40, 7  ;;  %v1744_v60 = vrot.slane %v4279_v12, 7 }
 0x29c   : > { %2192 = vmatmul.mubr.bf16.vlgmr.msra.gmra.mxu0 %v2049_v27  ;;  %v1864_v27 = vrot.slane %v4294_v11, 2 }
 0x29d   : > { %2201 = vmatprep.mubr.bf16.mxu0 %v3564_v14  ;;  %v1629_v14 = vrot.slane %v4290_v40, 5  ;;  %v1745_v18 = vsel %vm1742_vm6, %v1743_v57, %v1744_v60  ;;  %v1754_v19 = vsel %vm1742_vm6, 0.0, %v1743_v57 }
 0x29e   : > { %v1870_v35 = vsel %vm1858_vm8, %v1864_v27, 0.0 }
 0x29f   : > { %1883 = vperm.xlu1 %3203, %v2845_v58   ;;  %1878 = vperm.xlu0 %3202, %v2844_v4   ;;  %v1746_v58 = vrot.slane %v4281_v21, 7  ;;  %v1748_v4 = vrot.slane %v4294_v11, 7 }
 0x2a1   : > { %v4340_v20 = vsel %vm1742_vm6, %v1746_v58, %v1748_v4  ;;  %v1747_v37 = vsel %vm1742_vm6, %v1744_v60, %v1746_v58  ;;  %v1865_v60 = vsel %vm1858_vm8, %v1862_v49, %v1864_v27 }
 0x2a3   : > { %1893 = vperm.xlu1 %3203, %v2847_v61   ;;  %1888 = vperm.xlu0 %3202, %v2846_v43   ;;  %v1640_v61 = vsel %vm1628_vm4, 0.0, %v1629_v14  ;;  %v4325_v43 = vadd.f32 %v2824_v38, %v1612_v3  ;;  %v1807_v3 = vsel %vm1800_vm7, %v1804_v1, %v1806_v23 }
 0x2a4   : > { %2202 = vmatmul.mubr.bf16.gmra.mxu0 %v2050_v45  ;;  %v1918_v45 = vrot.slane %v4279_v12, 3 }
 0x2a6   : > { %v1921_v58 = vsel %vm1916_vm9, %v1918_v45, %v1920_v51 }
 0x2a7   : > { %1941 = vperm.xlu1 %3203, %v2851_v59   ;;  %1936 = vperm.xlu0 %3202, %v2850_v42   ;;  %v1631_v59 = vsel %vm1628_vm4, %v1629_v14, %v1630_v10 }
 0x2ab   : > { %1951 = vperm.xlu1 %3203, %v2853_v2   ;;  %1946 = vperm.xlu0 %3202, %v2852_v5   ;;  %v1635_v5 = vsel %vm1628_vm4, %v1632_v36, %v1634_v62  ;;  %v1917_v36 = vrot.slane %v4290_v40, 3 }
 0x2fa   : > { %v4267_v8 = vpop.permute.xlu1 %1657  ;;  %v4269_v32 = vpop.permute.xlu0 %1647 }
 0x2fb   : > { %v1665_v10 = vmul.f32 %v4269_v32, %v1640_v61  ;;  %v1667_v62 = vmul.f32 %v4267_v8, %v1633_v55  ;;  %v2831_v32 = vld [vmem:[%s3870_s16 + $0x1] ss:$0 sm:$0xff]  ;;  %v2837_v61 = vld [vmem:[%s3870_s16 + $0x2] ss:$0 sm:$0xff]  ;;  %v1919_v8 = vsel %vm1916_vm9, %v1917_v36, %v1918_v45 }
 0x2fd   : > { %v1676_v4 = vmul.f32 %v2825_v44, %v1665_v10  ;;  %v1678_v16 = vmul.f32 %v2825_v44, %v1667_v62 }
 0x2fe   : > { %v4271_v53 = vpop.permute.xlu1 %1662  ;;  %v4273_v33 = vpop.permute.xlu0 %1652 }
 0x2ff   : > { %v1666_v22 = vmul.f32 %v4273_v33, %v1631_v59  ;;  %v1812_v33 = vsel %vm1800_vm7, %v1806_v23, 0.0 }
 0x301   : > { %v1677_v57 = vmul.f32 %v2825_v44, %v1666_v22 }
 0x302   : > { %v4275_v34 = vpop.permute.xlu1 %1709  ;;  %v4277_v46 = vpop.permute.xlu0 %1704 }
 0x303   : > { %v1723_v39 = vmul.f32 %v4275_v34, %v1687_v30  ;;  %v1722_v29 = vmul.f32 %v4277_v46, %v1696_v9  ;;  %v4372_v46 = vsel %vm1916_vm9, %v1922_v25, 0.0  ;;  %v1923_v9 = vsel %vm1916_vm9, %v1920_v51, %v1922_v25 }
 0x305   : > { %v1735_v55 = vmul.f32 %v2831_v32, %v1723_v39  ;;  %v1734_v23 = vmul.f32 %v2831_v32, %v1722_v29 }
 0x306   : > { %v4284_v52 = vpop.permute.xlu1 %1719  ;;  %v4286_v15 = vpop.permute.xlu0 %1714 }
 0x307   : > { %v1724_v30 = vmul.f32 %v4286_v15, %v1689_v13  ;;  %v1680_v15 = vadd.f32 %v1676_v4, %v4315_v47  ;;  %v1725_v13 = vmul.f32 %v4284_v52, %v1691_v17 }
 0x309   : > { %v1736_v51 = vmul.f32 %v2831_v32, %v1724_v30  ;;  %v1737_v25 = vmul.f32 %v2831_v32, %v1725_v13 }
 0x30a   : > { %v4305_v50 = vpop.permute.xlu1 %1767  ;;  %v4307_v54 = vpop.permute.xlu0 %1762 }
 0x30b   : > { %v1781_v34 = vmul.f32 %v4305_v50, %v1745_v18  ;;  %v1780_v59 = vmul.f32 %v4307_v54, %v1754_v19  ;;  %v1668_v18 = vmul.f32 %v4271_v53, %v1635_v5  ;;  %v1681_v19 = vadd.f32 %v1677_v57, %v4317_v31  ;;  %v2855_v57 = vld [vmem:[%s3870_s16 + $0x6] ss:$0 sm:$0xff] }
 0x30d   : > { %v1793_v49 = vmul.f32 %v2837_v61, %v1781_v34  ;;  %v1739_v45 = vadd.f32 %v1735_v55, %v1681_v19  ;;  %v1679_v31 = vmul.f32 %v2825_v44, %v1668_v18 }
 0x30e   : > { %v4328_v42 = vpop.permute.xlu1 %1777  ;;  %v4330_v2 = vpop.permute.xlu0 %1772 }
 0x30f   : > { %v1782_v6 = vmul.f32 %v4330_v2, %v1747_v37  ;;  %v1797_v37 = vadd.f32 %v1793_v49, %v1739_v45  ;;  %v1783_v47 = vmul.f32 %v4328_v42, %v4340_v20  ;;  %v1683_v44 = vadd.f32 %v1679_v31, %v4325_v43 }
 0x311   : > { %v1794_v52 = vmul.f32 %v2837_v61, %v1782_v6  ;;  %v1795_v30 = vmul.f32 %v2837_v61, %v1783_v47 }
 0x312   : > { %v1826_v0 = vpop.permute.xlu1 %1825  ;;  %v1821_v7 = vpop.permute.xlu0 %1820 }
 0x313   : > { %v1839_v63 = vmul.f32 %v1826_v0, %v1805_v26  ;;  %v1838_v54 = vmul.f32 %v1821_v7, %v1803_v28  ;;  %v1792_v0 = vmul.f32 %v2837_v61, %v1780_v59  ;;  %v2849_v26 = vld [vmem:[%s3870_s16 + $0x5] ss:$0 sm:$0xff]  ;;  %v1682_v7 = vadd.f32 %v1678_v16, %v4313_v41 }
 0x314   : > { %v1738_v28 = vadd.f32 %v1734_v23, %v1680_v15  ;;  %v1741_v16 = vadd.f32 %v1737_v25, %v1683_v44 }
 0x315   : > { %v1851_v10 = vmul.f32 %v2843_v24, %v1839_v63  ;;  %v1850_v2 = vmul.f32 %v2843_v24, %v1838_v54  ;;  %v1740_v29 = vadd.f32 %v1736_v51, %v1682_v7 }
 0x316   : > { %v1836_v38 = vpop.permute.xlu1 %1835  ;;  %v1831_v14 = vpop.permute.xlu0 %1830  ;;  %v1796_v39 = vadd.f32 %v1792_v0, %v1738_v28 }
 0x317   : > { %v1840_v53 = vmul.f32 %v1831_v14, %v1807_v3  ;;  %v1855_v14 = vadd.f32 %v1851_v10, %v1797_v37  ;;  %v1841_v3 = vmul.f32 %v1836_v38, %v1812_v33  ;;  %v1798_v42 = vadd.f32 %v1794_v52, %v1740_v29  ;;  %v3230_v29 = vld [vmem:[%s3850_s6 + $0x28] sm:$0xff]  }
 0x318   : > { %v1854_v4 = vadd.f32 %v1850_v2, %v1796_v39 }
 0x319   : > { %v1853_v18 = vmul.f32 %v2843_v24, %v1841_v3  ;;  %v3232_v3 = vld [vmem:[%s3850_s6 + $0x18] sm:$0xff]  }
 0x31a   : > { %v1884_v50 = vpop.permute.xlu1 %1883  ;;  %v1879_v1 = vpop.permute.xlu0 %1878 }
 0x31b   : > { %v1897_v27 = vmul.f32 %v1884_v50, %v1863_v48  ;;  %v1896_v22 = vmul.f32 %v1879_v1, %v1861_v56  ;;  %v1852_v56 = vmul.f32 %v2843_v24, %v1840_v53 }
 0x31d   : > { %v1909_v17 = vmul.f32 %v2849_v26, %v1897_v27  ;;  %v1908_v48 = vmul.f32 %v2849_v26, %v1896_v22  ;;  %v1856_v38 = vadd.f32 %v1852_v56, %v1798_v42  ;;  %v3233_v56 = vld [vmem:[%s3850_s6 + $0x10] sm:$0xff]  }
 0x31e   : > { %v1894_v5 = vpop.permute.xlu1 %1893  ;;  %v1889_v36 = vpop.permute.xlu0 %1888 }
 0x31f   : > { %v1898_v62 = vmul.f32 %v1889_v36, %v1865_v60  ;;  %v1899_v20 = vmul.f32 %v1894_v5, %v1870_v35  ;;  %v1913_v63 = vadd.f32 %v1909_v17, %v1855_v14  ;;  %v1912_v60 = vadd.f32 %v1908_v48, %v1854_v4  ;;  %v3228_v48 = vld [vmem:[%s3850_s6 + $0x38] sm:$0xff]   ;;  %v3231_v14 = vld [vmem:[%s3850_s6 + $0x20] sm:$0xff]  }
 0x320   : > { %2979 = vmatprep.subr.bf16.mxu1 %v3228_v48 }
 0x321   : > { %v1910_v32 = vmul.f32 %v2849_v26, %v1898_v62  ;;  %2980 = vmatpush3.bf16.msra.mxu1 %v3228_v48  ;;  %v3229_v62 = vld [vmem:[%s3850_s6 + $0x30] sm:$0xff]  }
 0x322   : > { %v1942_v41 = vpop.permute.xlu1 %1941  ;;  %v1937_v34 = vpop.permute.xlu0 %1936  ;;  %2981 = vmatprep.subr.bf16.mxu1 %v3229_v62 }
 0x323   : > { %v1955_v59 = vmul.f32 %v1942_v41, %v1921_v58  ;;  %v1954_v55 = vmul.f32 %v1937_v34, %v1919_v8  ;;  %v1799_v58 = vadd.f32 %v1795_v30, %v1741_v16  ;;  %v1911_v8 = vmul.f32 %v2849_v26, %v1899_v20  ;;  %v3235_v41 = vld [vmem:[%s3850_s6] sm:$0xff]  }
 0x324   : > { %v1914_v35 = vadd.f32 %v1910_v32, %v1856_v38 }
 0x325   : > { %v1967_v50 = vmul.f32 %v2855_v57, %v1955_v59  ;;  %v1966_v1 = vmul.f32 %v2855_v57, %v1954_v55  ;;  %v1857_v6 = vadd.f32 %v1853_v18, %v1799_v58  ;;  %2982 = vmatpush3.bf16.msra.mxu1 %v3229_v62 }
 0x326   : > { %v1952_v33 = vpop.permute.xlu1 %1951  ;;  %v1947_v23 = vpop.permute.xlu0 %1946  ;;  %2983 = vmatprep.subr.bf16.mxu1 %v3230_v29 }
 0x327   : > { %v1957_v54 = vmul.f32 %v1952_v33, %v4372_v46  ;;  %v1956_v19 = vmul.f32 %v1947_v23, %v1923_v9  ;;  %v1971_v43 = vadd.f32 %v1967_v50, %v1913_v63  ;;  %v1970_v49 = vadd.f32 %v1966_v1, %v1912_v60  ;;  %v2856_v9 = vld [vmem:[%s4577_s19] ss:$0 sm:$0xff] }
 0x328   : > { %v1915_v13 = vadd.f32 %v1911_v8, %v1857_v6 }
 0x329   : > { %v1968_v61 = vmul.f32 %v2855_v57, %v1956_v19  ;;  %1976 = vadd.xlane.f32.xlu1 %v1971_v43  ;;  %1974 = vadd.xlane.f32.xlu0 %v1970_v49  ;;  %v1969_v27 = vmul.f32 %v2855_v57, %v1957_v54  ;;  %v3234_v57 = vld [vmem:[%s3850_s6 + $0x8] sm:$0xff]  }
 0x32a   : > { %2984 = vmatpush3.bf16.msra.mxu1 %v3230_v29 }
 0x32b   : > { %v1972_v15 = vadd.f32 %v1968_v61, %v1914_v35  ;;  %v1973_v24 = vadd.f32 %v1969_v27, %v1915_v13  ;;  %2985 = vmatprep.subr.bf16.mxu1 %v3231_v14 }
 0x32d   : > { %1978 = vadd.xlane.f32.xlu0 %v1972_v15 }
 0x32e   : > { %2986 = vmatpush3.bf16.msra.mxu1 %v3231_v14 }
 0x32f   : > { %2987 = vmatprep.subr.bf16.mxu1 %v3232_v3 }
 0x331   : > { %1980 = vadd.xlane.f32.xlu0 %v1973_v24 }
 0x332   : > { %2988 = vmatpush3.bf16.msra.mxu1 %v3232_v3 }
 0x333   : > { %2989 = vmatprep.subr.bf16.mxu1 %v3233_v56 }
 0x336   : > { %2990 = vmatpush3.bf16.msra.mxu1 %v3233_v56 }
 0x337   : > { %2991 = vmatprep.subr.bf16.mxu1 %v3234_v57 }
 0x33a   : > { %2992 = vmatpush3.bf16.msra.mxu1 %v3234_v57 }
 0x33b   : > { %2993 = vmatprep.subr.bf16.mxu1 %v3235_v41 }
 0x33e   : > { %2994 = vmatpush3.bf16.msra.mxu1 %v3235_v41 }
 0x35c   : > { %v2193_v63 = vpop.f32.mrf.mxu0 }
 0x35e   : > { %v2195_v18 = vpop.f32.mrf.mxu0 }
 0x360   : > { %v2197_v35 = vpop.f32.mrf.mxu0 }
 0x3b2   : > { %v1977_v0 = vpop.xlane.xlu1 %1976  ;;  %v1975_v22 = vpop.xlane.xlu0 %1974 }
 0x3b3   : > { %v1983_v45 = vmul.f32 0.0625, %v1977_v0  ;;  %v1982_v46 = vmul.f32 0.0625, %v1975_v22 }
 0x3b5   : > { %v1987_v26 = vsub.f32 %v1971_v43, %v1983_v45  ;;  %v1986_v51 = vsub.f32 %v1970_v49, %v1982_v46  ;;  %v2069_v49 = vlaneseq  ;;  %v2199_v46 = vpop.f32.mrf.mxu0 }
 0x3b6   : > { %v1979_v10 = vpop.xlane.xlu0 %1978 }
 0x3b7   : > { %v1984_v53 = vmul.f32 0.0625, %v1979_v10  ;;  %v4392_v5 = vmul.f32 %v2856_v9, %v1987_v26  ;;  %v4394_v36 = vmul.f32 %v2856_v9, %v1986_v51  ;;  %v2070_v0 = vshrl.u32 %v2069_v49, 7  ;;  %v2873_v49 = vld [vmem:[%s863_s23] ss:$0 sm:$0xff] }
 0x3b9   : > { %v1988_v7 = vsub.f32 %v1972_v15, %v1984_v53  ;;  %v2002_v31 = vmul.f32 %v4392_v5, %v4392_v5  ;;  %v2001_v28 = vmul.f32 %v4394_v36, %v4394_v36  ;;  %v2075_v51 = vsub.s32 1, %v2070_v0  ;;  %v2067_v53 = vld [vmem:[%s3880_s12] sm:$0x3] }
 0x3ba   : > { %v1981_v2 = vpop.xlane.xlu0 %1980 }
 0x3bb   : > { %v1985_v37 = vmul.f32 0.0625, %v1981_v2  ;;  %2007 = vadd.xlane.f32.xlu0 %v2002_v31  ;;  %2005 = vadd.xlane.f32.xlu1 %v2001_v28  ;;  %v4400_v47 = vmul.f32 %v2856_v9, %v1988_v7  ;;  %v2203_v7 = vpop.f32.mrf.mxu0  ;;  %v2071_v31 = vsub.s32 0, %v2070_v0  ;;  %v2076_v28 = vrot.slane %v2067_v53, %v2075_v51 }
 0x3bd   : > { %v1989_v52 = vsub.f32 %v1973_v24, %v1985_v37  ;;  %v2003_v17 = vmul.f32 %v4400_v47, %v4400_v47  ;;  %v2205_v2 = vpop.f32.mrf.mxu0  ;;  %v2072_v37 = vrot.slane %v2067_v53, %v2071_v31  ;;  %v2200_v62 = vadd.f32 %v2199_v46, %v2076_v28 }
 0x3bf   : > { %2009 = vadd.xlane.f32.xlu1 %v2003_v17  ;;  %v4404_v25 = vmul.f32 %v2856_v9, %v1989_v52  ;;  %v2207_v14 = vpop.f32.mrf.mxu0  ;;  %v2194_v3 = vadd.f32 %v2193_v63, %v2072_v37  ;;  %v2198_v41 = vadd.f32 %v2197_v35, %v2072_v37  ;;  %v2204_v63 = vadd.f32 %v2203_v7, %v2072_v37 }
 0x3c1   : > { %v2004_v39 = vmul.f32 %v4404_v25, %v4404_v25 }
 0x3c3   : > { %2011 = vadd.xlane.f32.xlu0 %v2004_v39  ;;  %v2196_v39 = vadd.f32 %v2195_v18, %v2076_v28  ;;  %v3236_v18 = vld [vmem:[%s3894_s4 + $0x38] sm:$0xff]  }
 0x3c4   : > { %2999 = vmatprep.subr.bf16.mxu0 %v3236_v18 }
 0x3c5   : > { %3000 = vmatpush3.bf16.msra.mxu0 %v3236_v18 }
 0x444   : > { %v2006_v34 = vpop.xlane.xlu1 %2005  ;;  %v2008_v44 = vpop.xlane.xlu0 %2007 }
 0x445   : > { %v2013_v4 = vmul.f32 0.06666667, %v2006_v34  ;;  %v2014_v59 = vmul.f32 0.06666667, %v2008_v44 }
 0x447   : > { %3244 = vrsqrt.f32 %v2013_v4  ;;  %vm2019_vm10 = vcmp.eq.f32.partialorder %v2013_v4, inf  ;;  %v2022_v60 = vand.u32 2147483648, %v2013_v4  ;;  %vm2021_vm11 = vcmp.eq.f32.partialorder %v2013_v4, 0.0 }
 0x448   : > { %3246 = vrsqrt.f32 %v2014_v59  ;;  %v2010_v55 = vpop.xlane.xlu1 %2009  ;;  %vm2026_vm12 = vcmp.eq.f32.partialorder %v2014_v59, inf  ;;  %v2029_v33 = vand.u32 2147483648, %v2014_v59  ;;  %vm2028_vm13 = vcmp.eq.f32.partialorder %v2014_v59, 0.0 }
 0x449   : > { %v2015_v30 = vmul.f32 0.06666667, %v2010_v55 }
 0x44b   : > { %3248 = vrsqrt.f32 %v2015_v30  ;;  %vm2033_vm14 = vcmp.eq.f32.partialorder %v2015_v30, inf  ;;  %v2036_v61 = vand.u32 2147483648, %v2015_v30  ;;  %vm2035_vm15 = vcmp.eq.f32.partialorder %v2015_v30, 0.0 }
 0x44c   : > { %v2012_v42 = vpop.xlane.xlu0 %2011 }
 0x44d   : > { %v2016_v20 = vmul.f32 0.06666667, %v2012_v42 }
 0x44f   : > { %3250 = vrsqrt.f32 %v2016_v20  ;;  %vm2040_vm0 = vcmp.eq.f32.partialorder %v2016_v20, inf  ;;  %v2043_v45 = vand.u32 2147483648, %v2016_v20  ;;  %vm2042_vm1 = vcmp.eq.f32.partialorder %v2016_v20, 0.0 }
 0x454   : > { %v3245_v32 = vpop.eup %3244 }
 0x455   : > { %v3247_v50 = vpop.eup %3246  ;;  %v2018_v1 = vmul.f32 %v3245_v32, %v2013_v4 }
 0x456   : > { %v2025_v16 = vmul.f32 %v3247_v50, %v2014_v59  ;;  %v2208_v50 = vadd.f32 %v2207_v14, %v2072_v37 }
 0x457   : > { %v2020_v38 = vsel %vm2019_vm10, %v2013_v4, %v2018_v1 }
 0x458   : > { %v3249_v23 = vpop.eup %3248  ;;  %v2027_v54 = vsel %vm2026_vm12, %v2014_v59, %v2025_v16  ;;  %v2023_v19 = vsel %vm2021_vm11, %v2022_v60, %v2020_v38  ;;  %v2209_v59 = vpop.f32.mrf.mxu0  ;;  %v3237_v38 = vld [vmem:[%s3894_s4 + $0x30] sm:$0xff]  }
 0x459   : > { %v2032_v43 = vmul.f32 %v3249_v23, %v2015_v30  ;;  %v2045_v58 = vadd.f32 1e-06, %v2023_v19  ;;  %v2030_v8 = vsel %vm2028_vm13, %v2029_v33, %v2027_v54  ;;  %v2210_v32 = vadd.f32 %v2209_v59, %v2076_v28  ;;  %3001 = vmatprep.subr.bf16.mxu0 %v3237_v38  ;;  %v3239_v33 = vld [vmem:[%s3894_s4 + $0x20] sm:$0xff]   ;;  %v3240_v23 = vld [vmem:[%s3894_s4 + $0x18] sm:$0xff]   ;;  %v3241_v54 = vld [vmem:[%s3894_s4 + $0x10] sm:$0xff]  }
 0x45a   : > { %v2046_v6 = vadd.f32 1e-06, %v2030_v8  ;;  %3002 = vmatpush3.bf16.msra.mxu0 %v3237_v38  ;;  %v3242_v19 = vld [vmem:[%s3894_s4 + $0x8] sm:$0xff]  }
 0x45b   : > { %v2034_v27 = vsel %vm2033_vm14, %v2015_v30, %v2032_v43  ;;  %3252 = vrcp.f32 %v2045_v58  ;;  %v2206_v30 = vadd.f32 %v2205_v2, %v2076_v28  ;;  %v3243_v43 = vld [vmem:[%s3894_s4] sm:$0xff]  }
 0x45c   : > { %v3251_v15 = vpop.eup %3250  ;;  %3254 = vrcp.f32 %v2046_v6  ;;  %v2037_v13 = vsel %vm2035_vm15, %v2036_v61, %v2034_v27 }
 0x45d   : > { %v2039_v24 = vmul.f32 %v3251_v15, %v2016_v20  ;;  %v2047_v22 = vadd.f32 1e-06, %v2037_v13 }
 0x45f   : > { %v2041_v9 = vsel %vm2040_vm0, %v2016_v20, %v2039_v24  ;;  %3256 = vrcp.f32 %v2047_v22 }
 0x460   : > { %v2044_v26 = vsel %vm2042_vm1, %v2043_v45, %v2041_v9 }
 0x461   : > { %v2048_v10 = vadd.f32 1e-06, %v2044_v26 }
 0x463   : > { %3258 = vrcp.f32 %v2048_v10 }
 0x468   : > { %v3253_v52 = vpop.eup %3252 }
 0x469   : > { %v3255_v17 = vpop.eup %3254  ;;  %v2213_v48 = vmul.f32 %v3253_v52, %v4394_v36 }
 0x46a   : > { %v2215_v29 = vmul.f32 %v3255_v17, %v4392_v5 }
 0x46b   : > { %v2220_v56 = vmul.f32 %v2213_v48, %v2196_v39 }
 0x46c   : > { %v3257_v57 = vpop.eup %3256  ;;  %v2221_v34 = vmul.f32 %v2215_v29, %v2200_v62 }
 0x46d   : > { %v2217_v44 = vmul.f32 %v3257_v57, %v4400_v47  ;;  %v2224_v4 = vadd.f32 %v2220_v56, %v2194_v3 }
 0x46e   : > { %v2225_v55 = vadd.f32 %v2221_v34, %v2198_v41 }
 0x46f   : > { %v2222_v36 = vmul.f32 %v2217_v44, %v2206_v30 }
 0x470   : > { %v3259_v42 = vpop.eup %3258  ;;  %v2228_v20 = vpack.c.bf16 %v2225_v55, %v2224_v4 }
 0x471   : > { %v2219_v5 = vmul.f32 %v3259_v42, %v4404_v25  ;;  %v2226_v47 = vadd.f32 %v2222_v36, %v2204_v63  ;;  %v3238_v25 = vld [vmem:[%s3894_s4 + $0x28] sm:$0xff]  }
 0x472   : > { %2995 = vmatprep.mubr.bf16.mxu1 %v2228_v20  ;;  %3003 = vmatprep.subr.bf16.mxu0 %v3238_v25 }
 0x473   : > { %v2223_v1 = vmul.f32 %v2219_v5, %v2210_v32  ;;  %3004 = vmatpush3.bf16.msra.mxu0 %v3238_v25 }
 0x474   : > { %3005 = vmatprep.subr.bf16.mxu0 %v3239_v33 }
 0x475   : > { %v2227_v60 = vadd.f32 %v2223_v1, %v2208_v50  ;;  %v2882_v50 = vld [vmem:[%s866_s17] ss:$0 sm:$0xff]  ;;  %s3565_s17 = smov [#allocation15]  }
 0x476   : > { %s2536_s29 = sshll.u32 %s3565_s17, 4  ;;  %s2537_s29 = int_to_ptr.vmem [resolvable:$true] %s2536_s29 }
 0x477   : > { %v2229_v16 = vpack.c.bf16 %v2227_v60, %v2226_v47  ;;  %3006 = vmatpush3.bf16.msra.mxu0 %v3239_v33  ;;  %v2891_v47 = vld [vmem:[%s869_s20] ss:$0 sm:$0xff]  ;;  %s3454_s20 = scalar_lea.vmem %s2537_s29, 512  ;;  %p3461_p5 = scmp.lt.s32.totalorder %s2537_s29, %s2537_s29 }
 0x478   : > { %3007 = vmatprep.subr.bf16.mxu0 %v3240_v23  ;;  %p3455_p4 = scmp.ne.s32.totalorder %s2537_s29, %s3454_s20  ;;  %p3462_p8 = scmp.lt.s32.totalorder %s3454_s20, %s3454_s20 }
 0x479   : > { %2996 = vmatmul.mubr.bf16.vlgmr.msra.gmra.mxu1 %v2229_v16 }
 0x47a   : > { %p3456_p2 = pnand %p3455_p4, %p3098_p3  ;;  %p3463_p11 = por %p3462_p8, %p3461_p5 }
 0x47b   : > { %3008 = vmatpush3.bf16.msra.mxu0 %v3240_v23 }
 0x47c   : > { %3009 = vmatprep.subr.bf16.mxu0 %v3241_v54  ;;  %p3457_p7 = pneg %p3456_p2 }
 0x47e   : > { %p3464_p12 = pnand %p3463_p11, %p3457_p7 }
 0x47f   : > { %3010 = vmatpush3.bf16.msra.mxu0 %v3241_v54 }
 0x480   : > { %3011 = vmatprep.subr.bf16.mxu0 %v3242_v19 }
 0x483   : > { %3012 = vmatpush3.bf16.msra.mxu0 %v3242_v19 }
 0x484   : > { %3013 = vmatprep.subr.bf16.mxu0 %v3243_v43 }
 0x487   : > { %3014 = vmatpush3.bf16.msra.mxu0 %v3243_v43 }
 0x539   : > { %v2997_v58 = vpop.f32.mrf.mxu1 }
 0x53a   : > { %v2344_v8 = vadd.f32 %v2997_v58, %v2873_v49 }
 0x53b   : > { %v2335_v61 = vpop.f32.mrf.mxu1 }
 0x53c   : > { %v2356_v35 = vmul.f32 0.044715, %v2344_v8  ;;  %v2336_v6 = vadd.f32 %v2873_v49, %v2335_v61  ;;  %v2352_v30 = vmul.f32 0.5, %v2344_v8 }
 0x53d   : > { %v2998_v27 = vpop.f32.mrf.mxu1 }
 0x53e   : > { %v2360_v15 = vmul.f32 %v2356_v35, %v2344_v8  ;;  %v2354_v13 = vmul.f32 0.044715, %v2336_v6  ;;  %v2347_v24 = vadd.f32 %v2998_v27, %v2873_v49  ;;  %v2350_v4 = vmul.f32 0.5, %v2336_v6 }
 0x53f   : > { %v2338_v0 = vpop.f32.mrf.mxu1 }
 0x540   : > { %v2364_v22 = vmul.f32 %v2360_v15, %v2344_v8  ;;  %v2358_v45 = vmul.f32 %v2354_v13, %v2336_v6  ;;  %v2357_v46 = vmul.f32 0.044715, %v2347_v24  ;;  %v2339_v9 = vadd.f32 %v2873_v49, %v2338_v0 }
 0x541   : > { %v2353_v34 = vmul.f32 0.5, %v2347_v24 }
 0x542   : > { %v2368_v26 = vadd.f32 %v2364_v22, %v2344_v8  ;;  %v2362_v51 = vmul.f32 %v2358_v45, %v2336_v6  ;;  %v2361_v10 = vmul.f32 %v2357_v46, %v2347_v24  ;;  %v2355_v53 = vmul.f32 0.044715, %v2339_v9 }
 0x543   : > { %v2351_v59 = vmul.f32 0.5, %v2339_v9 }
 0x544   : > { %v2372_v7 = vmul.f32 0.7978846, %v2368_v26  ;;  %v2365_v31 = vmul.f32 %v2361_v10, %v2347_v24  ;;  %v2366_v28 = vadd.f32 %v2362_v51, %v2336_v6  ;;  %v2359_v2 = vmul.f32 %v2355_v53, %v2339_v9 }
 0x546   : > { %v2369_v37 = vadd.f32 %v2365_v31, %v2347_v24  ;;  %v2370_v52 = vmul.f32 0.7978846, %v2366_v28  ;;  %v2363_v17 = vmul.f32 %v2359_v2, %v2339_v9  ;;  %3260 = vtanh.f32 %v2372_v7 }
 0x548   : > { %v2373_v39 = vmul.f32 0.7978846, %v2369_v37  ;;  %v2367_v48 = vadd.f32 %v2363_v17, %v2339_v9  ;;  %3262 = vtanh.f32 %v2370_v52 }
 0x54a   : > { %3264 = vtanh.f32 %v2373_v39  ;;  %v2371_v62 = vmul.f32 0.7978846, %v2367_v48 }
 0x54c   : > { %3266 = vtanh.f32 %v2371_v62 }
 0x553   : > { %v3261_v29 = vpop.eup %3260 }
 0x554   : > { %v2380_v44 = vadd.f32 1.0, %v3261_v29 }
 0x555   : > { %v3263_v14 = vpop.eup %3262 }
 0x556   : > { %v2378_v57 = vadd.f32 1.0, %v3263_v14  ;;  %v2384_v32 = vmul.f32 %v2380_v44, %v2352_v30 }
 0x557   : > { %v3265_v3 = vpop.eup %3264 }
 0x558   : > { %v2381_v56 = vadd.f32 1.0, %v3265_v3  ;;  %v2382_v20 = vmul.f32 %v2378_v57, %v2350_v4 }
 0x559   : > { %v3267_v41 = vpop.eup %3266 }
 0x55a   : > { %v2379_v55 = vadd.f32 1.0, %v3267_v41  ;;  %v2385_v42 = vmul.f32 %v2381_v56, %v2353_v34 }
 0x55c   : > { %v2383_v36 = vmul.f32 %v2379_v55, %v2351_v59  ;;  %v2387_v63 = vpack.c.bf16 %v2385_v42, %v2384_v32 }
 0x55e   : > { %v2386_v5 = vpack.c.bf16 %v2383_v36, %v2382_v20 }
 0x560   : > { %3015 = vmatprep.mubr.bf16.mxu0 %v2386_v5 }
 0x561   : > { %3016 = vmatmul.mubr.bf16.vlgmr.msra.gmra.mxu0 %v2387_v63 }
 0x621   : > { %v3017_v1 = vpop.f32.mrf.mxu0 }
 0x622   : > { %v2502_v60 = vadd.f32 %v3017_v1, %v2882_v50 }
 0x623   : > { %v2493_v16 = vpop.f32.mrf.mxu0 }
 0x624   : > { %v2517_v18 = vmul.f32 %v2891_v47, %v2502_v60  ;;  %v2494_v38 = vadd.f32 %v2882_v50, %v2493_v16 }
 0x625   : > { %v3018_v25 = vpop.f32.mrf.mxu0 }
 0x626   : > { %v2521_v33 = vadd.f32 %v2517_v18, %v4281_v21  ;;  %v2515_v23 = vmul.f32 %v2891_v47, %v2494_v38  ;;  %v2505_v54 = vadd.f32 %v3018_v25, %v2882_v50 }
 0x627   : > { %v2496_v19 = vpop.f32.mrf.mxu0 }
 0x628   : > { %2525 = vst [vmem:[#allocation15 + $0x10] sm:$0xff] %v2521_v33  ;;  %v2519_v43 = vadd.f32 %v2515_v23, %v4290_v40  ;;  %v2518_v49 = vmul.f32 %v2891_v47, %v2505_v54  ;;  %v2497_v58 = vadd.f32 %v2882_v50, %v2496_v19 }
 0x62a   : > { %2523 = vst [vmem:[#allocation15] sm:$0xff] %v2519_v43  ;;  %v2522_v8 = vadd.f32 %v2518_v49, %v4294_v11  ;;  %v2516_v61 = vmul.f32 %v2891_v47, %v2497_v58 }
 0x62c   : > { %2526 = vst [vmem:[#allocation15 + $0x18] sm:$0xff] %v2522_v8  ;;  %v2520_v21 = vadd.f32 %v2516_v61, %v4279_v12 }
 0x62e   : > { %2524 = vst [vmem:[#allocation15 + $0x8] sm:$0xff] %v2520_v21 }
 0x62f   : > { %3467 = shalt.err (!%p3464_p12)
}
 0x630   : > { %s3566_s21 = smov 128   ;;  %s3567_s25 = smov 8  }
 0x631   : > { %s4581_s26 = sld [smem:[#allocation43_spill]] }
 0x637   : > { %3061 = dma.vmem_to_hbm [thread:$0]  (%p3098_p3), %s2537_s29, 512, %s4581_s26, [#allocation5], %s3566_s21, %s3566_s21, %s3567_s25  }
 0x638   : > { %3519 = dma.done.wait (%p3098_p3), [#allocation5], 512  }
 0x639   : > { %3521 = vsyncadd (%p3098_p3), [#allocation5], 4294966784 }
 0x63a PF: > { %s36_s22 = sadd.s32 1, %s3544_s22   ;;  %s4582_s1 = sld [smem:[#allocation21_spill]] }
 0x63b   : > { %p33_p0 = scmp.ge.s32.totalorder %s36_s22, 4   ;;  %s4583_s20 = sld [smem:[#allocation24_spill]] }
 0x63c   : > { %s4584_s21 = sld [smem:[#allocation22_spill]]  ;;  %s4586_s0 = smov %s3528_s30 }
 0x63d   : > { %s4585_s27 = sld [smem:[#allocation23_spill]] }
 0x63f   :  { %35 = sbr.rel (!%p33_p0) target bundleno = 28 (0x1c), region = 206 }
 0x640   : > { %s4587_s30 = smov %s4582_s1 }
 0x643   : > { %s4588_s1 = smov %s4585_s27 }
 0x644   :  { %2552 = vsyncpa [#allocation4], 1 }
 0x645   :  { %2554 = vsyncpa [#allocation4 + $0x1], 1 }
 0x646   :  { %2555 = vsyncpa [#allocation7], 1 }
 0x647   :  { %2556 = vsyncpa [#allocation10], 1 }
 0x648   :  { %2557 = vsyncpa [#allocation13], 1 }
 0x649   :  { %2559 = vsyncpa [#allocation13 + $0x1], 1 }
 0x64a   :  { %2560 = vsyncpa [#allocation5], 1 }
 0x64b   :  { %2562 = vsyncpa [#allocation5 + $0x1], 1 }

</bundles_post_ra>
